<compile_context>
chip_gen: v5e
topology: v5e:2x2
jax: 0.10.0
libtpu: 0.0.40
codegen_flags: <defaults>
</compile_context>

<pallas_src>
import math

import numpy as np
import jax
import jax.numpy as jnp
from jax.experimental import pallas as pl
from jax.experimental.pallas import tpu as pltpu


# (Cin, Cout, K) for the six Conv1d layers of CNN1d_low.
CONV_CFG = [(1, 16, 5), (16, 16, 5), (16, 32, 3), (32, 32, 3), (32, 64, 3), (64, 64, 3)]
ATTN_DIM = CONV_CFG[-1][1]


def _build_layout():
    # Static packed-slab layout.  Weight slab rows per layer: layer 0 owns one (Cout, K)
    # block; layers 1..5 own K stacked (Cout, Cin) blocks; attention q/k/v/proj own
    # (C, C) blocks.  All row offsets are multiples of 16 -> sublane aligned.
    w_off, s_off = [], []
    wr, sr = 0, 0
    for i, (cin, cout, k) in enumerate(CONV_CFG):
        w_off.append(wr)
        s_off.append(sr)
        wr += cout if i == 0 else k * cout
        sr += cout
    for _ in range(4):                       # attention: query, key, value, proj
        w_off.append(wr)
        s_off.append(sr)
        wr += ATTN_DIM
        sr += ATTN_DIM
    return w_off, s_off, wr, sr


W_OFF, S_OFF, W_ROWS, S_ROWS = _build_layout()
W_COLS = max([CONV_CFG[0][2]] + [cin for cin, _, _ in CONV_CFG[1:]] + [ATTN_DIM])


# ----------------------------------------------------------------------------
# Fused kernel (one grid step == one batch element, activations are 2-D (C, T))
# ----------------------------------------------------------------------------
def _silu(y):
    # Overflow-safe SiLU: exp only sees non-positive arguments; exp + approx reciprocal
    # both go to the EUP slot (free relative to the VPU-bound elementwise work).
    z = jnp.exp(-jnp.abs(y))
    sig = jnp.where(y >= 0.0, 1.0, z) * pl.reciprocal(1.0 + z, approx=True)
    return y * sig


def _fused_kernel(x_ref, w_ref, s_ref, o_ref):
    x = x_ref[...]                                                      # (1, Tin) f32

    # ---- layer 0 (Cin == 1): depth-K im2col matmul so the MXU does the work.
    _, cout, k = CONV_CFG[0]
    t = x.shape[1] - k + 1
    patches = jnp.concatenate([x[:, j:j + t] for j in range(k)], axis=0)      # (K, t)
    w0 = w_ref[W_OFF[0]:W_OFF[0] + cout, 0:k]                                 # bf16 (Cout, K)
    y = jnp.dot(w0, patches.astype(jnp.bfloat16), preferred_element_type=jnp.float32)
    x = _silu(y + s_ref[S_OFF[0]:S_OFF[0] + cout, :])

    # ---- layers 1..5: K accumulating (Cout, Cin) x (Cin, t) matmuls, no im2col copies.
    for li in range(1, len(CONV_CFG)):
        cin, cout, k = CONV_CFG[li]
        t = x.shape[1] - k + 1
        xb = x.astype(jnp.bfloat16)
        row = W_OFF[li]
        y = jnp.zeros((cout, t), jnp.float32)
        for j in range(k):                                              # static K
            wj = w_ref[row + j * cout:row + (j + 1) * cout, 0:cin]      # bf16 (Cout, Cin)
            y = y + jnp.dot(wj, xb[:, j:j + t], preferred_element_type=jnp.float32)
        x = _silu(y + s_ref[S_OFF[li]:S_OFF[li] + cout, :])

    # ---- TemporalAttention: 1x1 conv q/k/v (scale folded into q), softmax, proj, residual.
    c = ATTN_DIM
    xb = x.astype(jnp.bfloat16)

    def proj(idx, inp_bf16):
        w = w_ref[W_OFF[idx]:W_OFF[idx] + c, 0:c]                       # bf16 (C, C)
        y = jnp.dot(w, inp_bf16, preferred_element_type=jnp.float32)
        return y + s_ref[S_OFF[idx]:S_OFF[idx] + c, :]

    q = proj(6, xb)
    kk = proj(7, xb)
    v = proj(8, xb)

    # scores[t, s] = sum_c q[c, t] * k[c, s]  -- contract dim 0 of both (no explicit q.T).
    scores = jax.lax.dot_general(q.astype(jnp.bfloat16), kk.astype(jnp.bfloat16),
                                 (((0,), (0,)), ((), ())),
                                 preferred_element_type=jnp.float32)
    scores = scores - jnp.max(scores, axis=-1, keepdims=True)
    p = jnp.exp(scores)
    attn = p / jnp.sum(p, axis=-1, keepdims=True)        # exact reciprocal: softmax parity

    # out[c, t] = sum_s v[c, s] * attn[t, s]  -- contract the shared time axis.
    out = jax.lax.dot_general(v.astype(jnp.bfloat16), attn.astype(jnp.bfloat16),
                              (((1,), (1,)), ((), ())),
                              preferred_element_type=jnp.float32)
    out = proj(9, out.astype(jnp.bfloat16))
    o_ref[...] = (out + x).astype(o_ref.dtype)


def cnn1d_low_forward(x, wbuf, sbuf):
    B, _, t_in = x.shape
    t_out = t_in - sum(k - 1 for _, _, k in CONV_CFG)
    c_out = ATTN_DIM

    # Advisory cost estimate so XLA can schedule/overlap the custom call.
    flops, trans = 0, 0
    t = t_in
    for cin, cout, k in CONV_CFG:
        t = t - k + 1
        flops += 2 * cout * cin * k * t
        trans += 2 * cout * t                      # exp + reciprocal in SiLU
    flops += 4 * 2 * c_out * c_out * t + 2 * 2 * c_out * t * t
    trans += t * t                                 # softmax exp
    cost = pl.CostEstimate(
        flops=int(B * flops),
        transcendentals=int(B * trans),
        bytes_accessed=int(x.size * 4 + wbuf.size * 2 + sbuf.size * 4 + B * c_out * t_out * 4),
    )

    return pl.pallas_call(
        _fused_kernel,
        out_shape=jax.ShapeDtypeStruct((B, c_out, t_out), jnp.float32),
        grid_spec=pltpu.PrefetchScalarGridSpec(
            num_scalar_prefetch=0,
            grid=(B,),
            in_specs=[
                pl.BlockSpec((None, 1, t_in), lambda b: (b, 0, 0)),     # per-batch input slice
                pl.BlockSpec((W_ROWS, W_COLS), lambda b: (0, 0)),       # resident weight slab
                pl.BlockSpec((S_ROWS, 1), lambda b: (0, 0)),            # resident shift slab
            ],
            out_specs=pl.BlockSpec((None, c_out, t_out), lambda b: (b, 0, 0)),
        ),
        compiler_params=pltpu.CompilerParams(
            dimension_semantics=("parallel",)),    # both TCs on v7x; harmless on v5e/v6e
        cost_estimate=cost,
    )(x, wbuf, sbuf)


# ----------------------------------------------------------------------------
# Deterministic parameter construction + host-side BN folding and slab packing
# ----------------------------------------------------------------------------
def init_conv1d(key, cout, cin, k):
    k1, k2 = jax.random.split(key)
    bound = 1.0 / math.sqrt(cin * k)
    w = jax.random.uniform(k1, (cout, cin, k), jnp.float32, -bound, bound)
    b = jax.random.uniform(k2, (cout,), jnp.float32, -bound, bound)
    return w, b


def init_bn(key, c):
    k1, k2, k3, k4 = jax.random.split(key, 4)
    gamma = 1.0 + 0.1 * jax.random.normal(k1, (c,), jnp.float32)
    beta = 0.1 * jax.random.normal(k2, (c,), jnp.float32)
    rmean = 0.1 * jax.random.normal(k3, (c,), jnp.float32)
    rvar = 1.0 + 0.1 * jnp.abs(jax.random.normal(k4, (c,), jnp.float32))
    return gamma, beta, rmean, rvar


def build_packed_params(key, eps=1e-5):
    """Fold inference-mode BN into conv weights and pack everything into two flat slabs."""
    wbuf = np.zeros((W_ROWS, W_COLS), np.float32)
    sbuf = np.zeros((S_ROWS, 1), np.float32)

    keys = jax.random.split(key, 2 * len(CONV_CFG) + 4)
    for i, (cin, cout, k) in enumerate(CONV_CFG):
        w, b = init_conv1d(keys[2 * i], cout, cin, k)
        gamma, beta, rmean, rvar = init_bn(keys[2 * i + 1], cout)
        scale = gamma / jnp.sqrt(rvar + eps)                    # (Cout,)
        shift = beta + (b - rmean) * scale                      # (Cout,)
        w = np.asarray(w * scale[:, None, None])                # BN scale folded into conv
        row = W_OFF[i]
        if i == 0:
            wbuf[row:row + cout, 0:k] = w[:, 0, :]              # (Cout, K) for the im2col path
        else:
            for j in range(k):
                wbuf[row + j * cout:row + (j + 1) * cout, 0:cin] = w[:, :, j]
        sbuf[S_OFF[i]:S_OFF[i] + cout, 0] = np.asarray(shift)

    attn_scale = ATTN_DIM ** (-0.5)
    for j in range(4):                                          # query, key, value, proj
        w, b = init_conv1d(keys[2 * len(CONV_CFG) + j], ATTN_DIM, ATTN_DIM, 1)
        w2 = np.asarray(w[:, :, 0])
        b2 = np.asarray(b)
        if j == 0:                                              # fold q.k scale into query proj
            w2 = w2 * attn_scale
            b2 = b2 * attn_scale
        wbuf[W_OFF[6 + j]:W_OFF[6 + j] + ATTN_DIM, 0:ATTN_DIM] = w2
        sbuf[S_OFF[6 + j]:S_OFF[6 + j] + ATTN_DIM, 0] = b2

    # bf16 MXU operands (native on v6e/v7x, supported on v5e); per-channel shifts stay f32.
    return jnp.asarray(wbuf, jnp.bfloat16), jnp.asarray(sbuf, jnp.float32)


if __name__ == "__main__":
    key = jax.random.PRNGKey(0)
    kx, kp = jax.random.split(key)

    B, Cin, T = 2, 1, 48            # after 6 valid convs: T_out = 48 - 16 = 32
    x = jax.random.normal(kx, (B, Cin, T), jnp.float32)

    wbuf, sbuf = build_packed_params(kp)

    fwd = jax.jit(cnn1d_low_forward)
    out = jax.block_until_ready(fwd(x, wbuf, sbuf))

    assert out.shape == (B, 64, T - 16), out.shape
    assert bool(jnp.all(jnp.isfinite(out)))
    print("KERNEL_OK")
</pallas_src>

<mosaic_0001>
module attributes {stable_mosaic.version = 11 : i64} {
  func.func @_fused_kernel(%arg0: i32, %arg1: memref<1x1x48xf32, #tpu.memory_space<vmem>>, %arg2: memref<928x64xbf16, #tpu.memory_space<vmem>>, %arg3: memref<480x1xf32, #tpu.memory_space<vmem>>, %arg4: memref<1x64x32xf32, #tpu.memory_space<vmem>>) attributes {dimension_semantics = [#tpu.dimension_semantics<parallel>], iteration_bounds = array<i64: 2>, scalar_prefetch = 0 : i64, scratch_operands = 0 : i64, tpu.core_type = #tpu.core_type<tc>, window_params = [{transform_indices = @transform_0, window_bounds = array<i64: 1, 1, 48>}, {pipeline_mode = #tpu.pipeline_mode<synchronous>, transform_indices = @transform_1, window_bounds = array<i64: 928, 64>}, {pipeline_mode = #tpu.pipeline_mode<synchronous>, transform_indices = @transform_2, window_bounds = array<i64: 480, 1>}, {transform_indices = @transform_3, window_bounds = array<i64: 1, 64, 32>}]} {
    %c0 = arith.constant 0 : index
    %c0_0 = arith.constant 0 : index
    %c0_1 = arith.constant 0 : index
    %0 = vector.load %arg1[%c0, %c0_0, %c0_1] : memref<1x1x48xf32, #tpu.memory_space<vmem>>, vector<1x1x48xf32>
    %1 = vector.shape_cast %0 : vector<1x1x48xf32> to vector<1x48xf32>
    %2 = vector.extract_strided_slice %1 {offsets = [0, 0], sizes = [1, 44], strides = [1, 1]} : vector<1x48xf32> to vector<1x44xf32>
    %3 = vector.extract_strided_slice %1 {offsets = [0, 1], sizes = [1, 44], strides = [1, 1]} : vector<1x48xf32> to vector<1x44xf32>
    %4 = vector.extract_strided_slice %1 {offsets = [0, 2], sizes = [1, 44], strides = [1, 1]} : vector<1x48xf32> to vector<1x44xf32>
    %5 = vector.extract_strided_slice %1 {offsets = [0, 3], sizes = [1, 44], strides = [1, 1]} : vector<1x48xf32> to vector<1x44xf32>
    %6 = vector.extract_strided_slice %1 {offsets = [0, 4], sizes = [1, 44], strides = [1, 1]} : vector<1x48xf32> to vector<1x44xf32>
    %7 = tpu.concatenate %2, %3, %4, %5, %6 in 0 : vector<1x44xf32>, vector<1x44xf32>, vector<1x44xf32>, vector<1x44xf32>, vector<1x44xf32> -> vector<5x44xf32>
    %c0_2 = arith.constant 0 : index
    %c0_3 = arith.constant 0 : index
    %8 = vector.load %arg2[%c0_2, %c0_3] : memref<928x64xbf16, #tpu.memory_space<vmem>>, vector<16x5xbf16>
    %9 = arith.truncf %7 : vector<5x44xf32> to vector<5x44xbf16>
    %cst = arith.constant dense<0.000000e+00> : vector<16x44xf32>
    %10 = tpu.matmul %8, %9, %cst {dimension_numbers = #tpu.dot_dimension_numbers<[1], [0], [0], [1], [0, 0, 1, 1], [], []>} : vector<16x5xbf16>, vector<5x44xbf16>, vector<16x44xf32> -> vector<16x44xf32>
    %c0_4 = arith.constant 0 : index
    %c0_5 = arith.constant 0 : index
    %11 = vector.load %arg3[%c0_4, %c0_5] : memref<480x1xf32, #tpu.memory_space<vmem>>, vector<16x1xf32>
    %12 = vector.broadcast %11 : vector<16x1xf32> to vector<16x44xf32>
    %13 = arith.addf %10, %12 : vector<16x44xf32>
    %14 = math.absf %13 : vector<16x44xf32>
    %cst_6 = arith.constant 0.000000e+00 : f32
    %15 = vector.broadcast %cst_6 : f32 to vector<16x44xf32>
    %16 = arith.subf %15, %14 : vector<16x44xf32>
    %17 = math.exp %16 : vector<16x44xf32>
    %cst_7 = arith.constant 0.000000e+00 : f32
    %18 = vector.broadcast %cst_7 : f32 to vector<16x44xf32>
    %19 = arith.cmpf oge, %13, %18 : vector<16x44xf32>
    %cst_8 = arith.constant 1.000000e+00 : f32
    %20 = vector.broadcast %cst_8 : f32 to vector<16x44xf32>
    %21 = arith.select %19, %20, %17 : vector<16x44xi1>, vector<16x44xf32>
    %cst_9 = arith.constant 1.000000e+00 : f32
    %22 = vector.broadcast %cst_9 : f32 to vector<16x44xf32>
    %23 = arith.addf %22, %17 : vector<16x44xf32>
    %24 = tpu.reciprocal %23 {approx = true} : vector<16x44xf32> -> vector<16x44xf32>
    %25 = arith.mulf %21, %24 : vector<16x44xf32>
    %26 = arith.mulf %13, %25 : vector<16x44xf32>
    %27 = arith.truncf %26 : vector<16x44xf32> to vector<16x44xbf16>
    %cst_10 = arith.constant 0.000000e+00 : f32
    %28 = vector.broadcast %cst_10 : f32 to vector<16x40xf32>
    %c16 = arith.constant 16 : index
    %c0_11 = arith.constant 0 : index
    %29 = vector.load %arg2[%c16, %c0_11] : memref<928x64xbf16, #tpu.memory_space<vmem>>, vector<16x16xbf16>
    %30 = vector.extract_strided_slice %27 {offsets = [0, 0], sizes = [16, 40], strides = [1, 1]} : vector<16x44xbf16> to vector<16x40xbf16>
    %cst_12 = arith.constant dense<0.000000e+00> : vector<16x40xf32>
    %31 = tpu.matmul %29, %30, %cst_12 {dimension_numbers = #tpu.dot_dimension_numbers<[1], [0], [0], [1], [0, 0, 1, 1], [], []>} : vector<16x16xbf16>, vector<16x40xbf16>, vector<16x40xf32> -> vector<16x40xf32>
    %32 = arith.addf %28, %31 : vector<16x40xf32>
    %c32 = arith.constant 32 : index
    %c0_13 = arith.constant 0 : index
    %33 = vector.load %arg2[%c32, %c0_13] : memref<928x64xbf16, #tpu.memory_space<vmem>>, vector<16x16xbf16>
    %34 = vector.extract_strided_slice %27 {offsets = [0, 1], sizes = [16, 40], strides = [1, 1]} : vector<16x44xbf16> to vector<16x40xbf16>
    %cst_14 = arith.constant dense<0.000000e+00> : vector<16x40xf32>
    %35 = tpu.matmul %33, %34, %cst_14 {dimension_numbers = #tpu.dot_dimension_numbers<[1], [0], [0], [1], [0, 0, 1, 1], [], []>} : vector<16x16xbf16>, vector<16x40xbf16>, vector<16x40xf32> -> vector<16x40xf32>
    %36 = arith.addf %32, %35 : vector<16x40xf32>
    %c48 = arith.constant 48 : index
    %c0_15 = arith.constant 0 : index
    %37 = vector.load %arg2[%c48, %c0_15] : memref<928x64xbf16, #tpu.memory_space<vmem>>, vector<16x16xbf16>
    %38 = vector.extract_strided_slice %27 {offsets = [0, 2], sizes = [16, 40], strides = [1, 1]} : vector<16x44xbf16> to vector<16x40xbf16>
    %cst_16 = arith.constant dense<0.000000e+00> : vector<16x40xf32>
    %39 = tpu.matmul %37, %38, %cst_16 {dimension_numbers = #tpu.dot_dimension_numbers<[1], [0], [0], [1], [0, 0, 1, 1], [], []>} : vector<16x16xbf16>, vector<16x40xbf16>, vector<16x40xf32> -> vector<16x40xf32>
    %40 = arith.addf %36, %39 : vector<16x40xf32>
    %c64 = arith.constant 64 : index
    %c0_17 = arith.constant 0 : index
    %41 = vector.load %arg2[%c64, %c0_17] : memref<928x64xbf16, #tpu.memory_space<vmem>>, vector<16x16xbf16>
    %42 = vector.extract_strided_slice %27 {offsets = [0, 3], sizes = [16, 40], strides = [1, 1]} : vector<16x44xbf16> to vector<16x40xbf16>
    %cst_18 = arith.constant dense<0.000000e+00> : vector<16x40xf32>
    %43 = tpu.matmul %41, %42, %cst_18 {dimension_numbers = #tpu.dot_dimension_numbers<[1], [0], [0], [1], [0, 0, 1, 1], [], []>} : vector<16x16xbf16>, vector<16x40xbf16>, vector<16x40xf32> -> vector<16x40xf32>
    %44 = arith.addf %40, %43 : vector<16x40xf32>
    %c80 = arith.constant 80 : index
    %c0_19 = arith.constant 0 : index
    %45 = vector.load %arg2[%c80, %c0_19] : memref<928x64xbf16, #tpu.memory_space<vmem>>, vector<16x16xbf16>
    %46 = vector.extract_strided_slice %27 {offsets = [0, 4], sizes = [16, 40], strides = [1, 1]} : vector<16x44xbf16> to vector<16x40xbf16>
    %cst_20 = arith.constant dense<0.000000e+00> : vector<16x40xf32>
    %47 = tpu.matmul %45, %46, %cst_20 {dimension_numbers = #tpu.dot_dimension_numbers<[1], [0], [0], [1], [0, 0, 1, 1], [], []>} : vector<16x16xbf16>, vector<16x40xbf16>, vector<16x40xf32> -> vector<16x40xf32>
    %48 = arith.addf %44, %47 : vector<16x40xf32>
    %c16_21 = arith.constant 16 : index
    %c0_22 = arith.constant 0 : index
    %49 = vector.load %arg3[%c16_21, %c0_22] : memref<480x1xf32, #tpu.memory_space<vmem>>, vector<16x1xf32>
    %50 = vector.broadcast %49 : vector<16x1xf32> to vector<16x40xf32>
    %51 = arith.addf %48, %50 : vector<16x40xf32>
    %52 = math.absf %51 : vector<16x40xf32>
    %cst_23 = arith.constant 0.000000e+00 : f32
    %53 = vector.broadcast %cst_23 : f32 to vector<16x40xf32>
    %54 = arith.subf %53, %52 : vector<16x40xf32>
    %55 = math.exp %54 : vector<16x40xf32>
    %cst_24 = arith.constant 0.000000e+00 : f32
    %56 = vector.broadcast %cst_24 : f32 to vector<16x40xf32>
    %57 = arith.cmpf oge, %51, %56 : vector<16x40xf32>
    %cst_25 = arith.constant 1.000000e+00 : f32
    %58 = vector.broadcast %cst_25 : f32 to vector<16x40xf32>
    %59 = arith.select %57, %58, %55 : vector<16x40xi1>, vector<16x40xf32>
    %cst_26 = arith.constant 1.000000e+00 : f32
    %60 = vector.broadcast %cst_26 : f32 to vector<16x40xf32>
    %61 = arith.addf %60, %55 : vector<16x40xf32>
    %62 = tpu.reciprocal %61 {approx = true} : vector<16x40xf32> -> vector<16x40xf32>
    %63 = arith.mulf %59, %62 : vector<16x40xf32>
    %64 = arith.mulf %51, %63 : vector<16x40xf32>
    %65 = arith.truncf %64 : vector<16x40xf32> to vector<16x40xbf16>
    %cst_27 = arith.constant 0.000000e+00 : f32
    %66 = vector.broadcast %cst_27 : f32 to vector<32x38xf32>
    %c96 = arith.constant 96 : index
    %c0_28 = arith.constant 0 : index
    %67 = vector.load %arg2[%c96, %c0_28] : memref<928x64xbf16, #tpu.memory_space<vmem>>, vector<32x16xbf16>
    %68 = vector.extract_strided_slice %65 {offsets = [0, 0], sizes = [16, 38], strides = [1, 1]} : vector<16x40xbf16> to vector<16x38xbf16>
    %cst_29 = arith.constant dense<0.000000e+00> : vector<32x38xf32>
    %69 = tpu.matmul %67, %68, %cst_29 {dimension_numbers = #tpu.dot_dimension_numbers<[1], [0], [0], [1], [0, 0, 1, 1], [], []>} : vector<32x16xbf16>, vector<16x38xbf16>, vector<32x38xf32> -> vector<32x38xf32>
    %70 = arith.addf %66, %69 : vector<32x38xf32>
    %c128 = arith.constant 128 : index
    %c0_30 = arith.constant 0 : index
    %71 = vector.load %arg2[%c128, %c0_30] : memref<928x64xbf16, #tpu.memory_space<vmem>>, vector<32x16xbf16>
    %72 = vector.extract_strided_slice %65 {offsets = [0, 1], sizes = [16, 38], strides = [1, 1]} : vector<16x40xbf16> to vector<16x38xbf16>
    %cst_31 = arith.constant dense<0.000000e+00> : vector<32x38xf32>
    %73 = tpu.matmul %71, %72, %cst_31 {dimension_numbers = #tpu.dot_dimension_numbers<[1], [0], [0], [1], [0, 0, 1, 1], [], []>} : vector<32x16xbf16>, vector<16x38xbf16>, vector<32x38xf32> -> vector<32x38xf32>
    %74 = arith.addf %70, %73 : vector<32x38xf32>
    %c160 = arith.constant 160 : index
    %c0_32 = arith.constant 0 : index
    %75 = vector.load %arg2[%c160, %c0_32] : memref<928x64xbf16, #tpu.memory_space<vmem>>, vector<32x16xbf16>
    %76 = vector.extract_strided_slice %65 {offsets = [0, 2], sizes = [16, 38], strides = [1, 1]} : vector<16x40xbf16> to vector<16x38xbf16>
    %cst_33 = arith.constant dense<0.000000e+00> : vector<32x38xf32>
    %77 = tpu.matmul %75, %76, %cst_33 {dimension_numbers = #tpu.dot_dimension_numbers<[1], [0], [0], [1], [0, 0, 1, 1], [], []>} : vector<32x16xbf16>, vector<16x38xbf16>, vector<32x38xf32> -> vector<32x38xf32>
    %78 = arith.addf %74, %77 : vector<32x38xf32>
    %c32_34 = arith.constant 32 : index
    %c0_35 = arith.constant 0 : index
    %79 = vector.load %arg3[%c32_34, %c0_35] : memref<480x1xf32, #tpu.memory_space<vmem>>, vector<32x1xf32>
    %80 = vector.broadcast %79 : vector<32x1xf32> to vector<32x38xf32>
    %81 = arith.addf %78, %80 : vector<32x38xf32>
    %82 = math.absf %81 : vector<32x38xf32>
    %cst_36 = arith.constant 0.000000e+00 : f32
    %83 = vector.broadcast %cst_36 : f32 to vector<32x38xf32>
    %84 = arith.subf %83, %82 : vector<32x38xf32>
    %85 = math.exp %84 : vector<32x38xf32>
    %cst_37 = arith.constant 0.000000e+00 : f32
    %86 = vector.broadcast %cst_37 : f32 to vector<32x38xf32>
    %87 = arith.cmpf oge, %81, %86 : vector<32x38xf32>
    %cst_38 = arith.constant 1.000000e+00 : f32
    %88 = vector.broadcast %cst_38 : f32 to vector<32x38xf32>
    %89 = arith.select %87, %88, %85 : vector<32x38xi1>, vector<32x38xf32>
    %cst_39 = arith.constant 1.000000e+00 : f32
    %90 = vector.broadcast %cst_39 : f32 to vector<32x38xf32>
    %91 = arith.addf %90, %85 : vector<32x38xf32>
    %92 = tpu.reciprocal %91 {approx = true} : vector<32x38xf32> -> vector<32x38xf32>
    %93 = arith.mulf %89, %92 : vector<32x38xf32>
    %94 = arith.mulf %81, %93 : vector<32x38xf32>
    %95 = arith.truncf %94 : vector<32x38xf32> to vector<32x38xbf16>
    %cst_40 = arith.constant 0.000000e+00 : f32
    %96 = vector.broadcast %cst_40 : f32 to vector<32x36xf32>
    %c192 = arith.constant 192 : index
    %c0_41 = arith.constant 0 : index
    %97 = vector.load %arg2[%c192, %c0_41] : memref<928x64xbf16, #tpu.memory_space<vmem>>, vector<32x32xbf16>
    %98 = vector.extract_strided_slice %95 {offsets = [0, 0], sizes = [32, 36], strides = [1, 1]} : vector<32x38xbf16> to vector<32x36xbf16>
    %cst_42 = arith.constant dense<0.000000e+00> : vector<32x36xf32>
    %99 = tpu.matmul %97, %98, %cst_42 {dimension_numbers = #tpu.dot_dimension_numbers<[1], [0], [0], [1], [0, 0, 1, 1], [], []>} : vector<32x32xbf16>, vector<32x36xbf16>, vector<32x36xf32> -> vector<32x36xf32>
    %100 = arith.addf %96, %99 : vector<32x36xf32>
    %c224 = arith.constant 224 : index
    %c0_43 = arith.constant 0 : index
    %101 = vector.load %arg2[%c224, %c0_43] : memref<928x64xbf16, #tpu.memory_space<vmem>>, vector<32x32xbf16>
    %102 = vector.extract_strided_slice %95 {offsets = [0, 1], sizes = [32, 36], strides = [1, 1]} : vector<32x38xbf16> to vector<32x36xbf16>
    %cst_44 = arith.constant dense<0.000000e+00> : vector<32x36xf32>
    %103 = tpu.matmul %101, %102, %cst_44 {dimension_numbers = #tpu.dot_dimension_numbers<[1], [0], [0], [1], [0, 0, 1, 1], [], []>} : vector<32x32xbf16>, vector<32x36xbf16>, vector<32x36xf32> -> vector<32x36xf32>
    %104 = arith.addf %100, %103 : vector<32x36xf32>
    %c256 = arith.constant 256 : index
    %c0_45 = arith.constant 0 : index
    %105 = vector.load %arg2[%c256, %c0_45] : memref<928x64xbf16, #tpu.memory_space<vmem>>, vector<32x32xbf16>
    %106 = vector.extract_strided_slice %95 {offsets = [0, 2], sizes = [32, 36], strides = [1, 1]} : vector<32x38xbf16> to vector<32x36xbf16>
    %cst_46 = arith.constant dense<0.000000e+00> : vector<32x36xf32>
    %107 = tpu.matmul %105, %106, %cst_46 {dimension_numbers = #tpu.dot_dimension_numbers<[1], [0], [0], [1], [0, 0, 1, 1], [], []>} : vector<32x32xbf16>, vector<32x36xbf16>, vector<32x36xf32> -> vector<32x36xf32>
    %108 = arith.addf %104, %107 : vector<32x36xf32>
    %c64_47 = arith.constant 64 : index
    %c0_48 = arith.constant 0 : index
    %109 = vector.load %arg3[%c64_47, %c0_48] : memref<480x1xf32, #tpu.memory_space<vmem>>, vector<32x1xf32>
    %110 = vector.broadcast %109 : vector<32x1xf32> to vector<32x36xf32>
    %111 = arith.addf %108, %110 : vector<32x36xf32>
    %112 = math.absf %111 : vector<32x36xf32>
    %cst_49 = arith.constant 0.000000e+00 : f32
    %113 = vector.broadcast %cst_49 : f32 to vector<32x36xf32>
    %114 = arith.subf %113, %112 : vector<32x36xf32>
    %115 = math.exp %114 : vector<32x36xf32>
    %cst_50 = arith.constant 0.000000e+00 : f32
    %116 = vector.broadcast %cst_50 : f32 to vector<32x36xf32>
    %117 = arith.cmpf oge, %111, %116 : vector<32x36xf32>
    %cst_51 = arith.constant 1.000000e+00 : f32
    %118 = vector.broadcast %cst_51 : f32 to vector<32x36xf32>
    %119 = arith.select %117, %118, %115 : vector<32x36xi1>, vector<32x36xf32>
    %cst_52 = arith.constant 1.000000e+00 : f32
    %120 = vector.broadcast %cst_52 : f32 to vector<32x36xf32>
    %121 = arith.addf %120, %115 : vector<32x36xf32>
    %122 = tpu.reciprocal %121 {approx = true} : vector<32x36xf32> -> vector<32x36xf32>
    %123 = arith.mulf %119, %122 : vector<32x36xf32>
    %124 = arith.mulf %111, %123 : vector<32x36xf32>
    %125 = arith.truncf %124 : vector<32x36xf32> to vector<32x36xbf16>
    %cst_53 = arith.constant 0.000000e+00 : f32
    %126 = vector.broadcast %cst_53 : f32 to vector<64x34xf32>
    %c288 = arith.constant 288 : index
    %c0_54 = arith.constant 0 : index
    %127 = vector.load %arg2[%c288, %c0_54] : memref<928x64xbf16, #tpu.memory_space<vmem>>, vector<64x32xbf16>
    %128 = vector.extract_strided_slice %125 {offsets = [0, 0], sizes = [32, 34], strides = [1, 1]} : vector<32x36xbf16> to vector<32x34xbf16>
    %cst_55 = arith.constant dense<0.000000e+00> : vector<64x34xf32>
    %129 = tpu.matmul %127, %128, %cst_55 {dimension_numbers = #tpu.dot_dimension_numbers<[1], [0], [0], [1], [0, 0, 1, 1], [], []>} : vector<64x32xbf16>, vector<32x34xbf16>, vector<64x34xf32> -> vector<64x34xf32>
    %130 = arith.addf %126, %129 : vector<64x34xf32>
    %c352 = arith.constant 352 : index
    %c0_56 = arith.constant 0 : index
    %131 = vector.load %arg2[%c352, %c0_56] : memref<928x64xbf16, #tpu.memory_space<vmem>>, vector<64x32xbf16>
    %132 = vector.extract_strided_slice %125 {offsets = [0, 1], sizes = [32, 34], strides = [1, 1]} : vector<32x36xbf16> to vector<32x34xbf16>
    %cst_57 = arith.constant dense<0.000000e+00> : vector<64x34xf32>
    %133 = tpu.matmul %131, %132, %cst_57 {dimension_numbers = #tpu.dot_dimension_numbers<[1], [0], [0], [1], [0, 0, 1, 1], [], []>} : vector<64x32xbf16>, vector<32x34xbf16>, vector<64x34xf32> -> vector<64x34xf32>
    %134 = arith.addf %130, %133 : vector<64x34xf32>
    %c416 = arith.constant 416 : index
    %c0_58 = arith.constant 0 : index
    %135 = vector.load %arg2[%c416, %c0_58] : memref<928x64xbf16, #tpu.memory_space<vmem>>, vector<64x32xbf16>
    %136 = vector.extract_strided_slice %125 {offsets = [0, 2], sizes = [32, 34], strides = [1, 1]} : vector<32x36xbf16> to vector<32x34xbf16>
    %cst_59 = arith.constant dense<0.000000e+00> : vector<64x34xf32>
    %137 = tpu.matmul %135, %136, %cst_59 {dimension_numbers = #tpu.dot_dimension_numbers<[1], [0], [0], [1], [0, 0, 1, 1], [], []>} : vector<64x32xbf16>, vector<32x34xbf16>, vector<64x34xf32> -> vector<64x34xf32>
    %138 = arith.addf %134, %137 : vector<64x34xf32>
    %c96_60 = arith.constant 96 : index
    %c0_61 = arith.constant 0 : index
    %139 = vector.load %arg3[%c96_60, %c0_61] : memref<480x1xf32, #tpu.memory_space<vmem>>, vector<64x1xf32>
    %140 = vector.broadcast %139 : vector<64x1xf32> to vector<64x34xf32>
    %141 = arith.addf %138, %140 : vector<64x34xf32>
    %142 = math.absf %141 : vector<64x34xf32>
    %cst_62 = arith.constant 0.000000e+00 : f32
    %143 = vector.broadcast %cst_62 : f32 to vector<64x34xf32>
    %144 = arith.subf %143, %142 : vector<64x34xf32>
    %145 = math.exp %144 : vector<64x34xf32>
    %cst_63 = arith.constant 0.000000e+00 : f32
    %146 = vector.broadcast %cst_63 : f32 to vector<64x34xf32>
    %147 = arith.cmpf oge, %141, %146 : vector<64x34xf32>
    %cst_64 = arith.constant 1.000000e+00 : f32
    %148 = vector.broadcast %cst_64 : f32 to vector<64x34xf32>
    %149 = arith.select %147, %148, %145 : vector<64x34xi1>, vector<64x34xf32>
    %cst_65 = arith.constant 1.000000e+00 : f32
    %150 = vector.broadcast %cst_65 : f32 to vector<64x34xf32>
    %151 = arith.addf %150, %145 : vector<64x34xf32>
    %152 = tpu.reciprocal %151 {approx = true} : vector<64x34xf32> -> vector<64x34xf32>
    %153 = arith.mulf %149, %152 : vector<64x34xf32>
    %154 = arith.mulf %141, %153 : vector<64x34xf32>
    %155 = arith.truncf %154 : vector<64x34xf32> to vector<64x34xbf16>
    %cst_66 = arith.constant 0.000000e+00 : f32
    %156 = vector.broadcast %cst_66 : f32 to vector<64x32xf32>
    %c480 = arith.constant 480 : index
    %c0_67 = arith.constant 0 : index
    %157 = vector.load %arg2[%c480, %c0_67] : memref<928x64xbf16, #tpu.memory_space<vmem>>, vector<64x64xbf16>
    %158 = vector.extract_strided_slice %155 {offsets = [0, 0], sizes = [64, 32], strides = [1, 1]} : vector<64x34xbf16> to vector<64x32xbf16>
    %cst_68 = arith.constant dense<0.000000e+00> : vector<64x32xf32>
    %159 = tpu.matmul %157, %158, %cst_68 {dimension_numbers = #tpu.dot_dimension_numbers<[1], [0], [0], [1], [0, 0, 1, 1], [], []>} : vector<64x64xbf16>, vector<64x32xbf16>, vector<64x32xf32> -> vector<64x32xf32>
    %160 = arith.addf %156, %159 : vector<64x32xf32>
    %c544 = arith.constant 544 : index
    %c0_69 = arith.constant 0 : index
    %161 = vector.load %arg2[%c544, %c0_69] : memref<928x64xbf16, #tpu.memory_space<vmem>>, vector<64x64xbf16>
    %162 = vector.extract_strided_slice %155 {offsets = [0, 1], sizes = [64, 32], strides = [1, 1]} : vector<64x34xbf16> to vector<64x32xbf16>
    %cst_70 = arith.constant dense<0.000000e+00> : vector<64x32xf32>
    %163 = tpu.matmul %161, %162, %cst_70 {dimension_numbers = #tpu.dot_dimension_numbers<[1], [0], [0], [1], [0, 0, 1, 1], [], []>} : vector<64x64xbf16>, vector<64x32xbf16>, vector<64x32xf32> -> vector<64x32xf32>
    %164 = arith.addf %160, %163 : vector<64x32xf32>
    %c608 = arith.constant 608 : index
    %c0_71 = arith.constant 0 : index
    %165 = vector.load %arg2[%c608, %c0_71] : memref<928x64xbf16, #tpu.memory_space<vmem>>, vector<64x64xbf16>
    %166 = vector.extract_strided_slice %155 {offsets = [0, 2], sizes = [64, 32], strides = [1, 1]} : vector<64x34xbf16> to vector<64x32xbf16>
    %cst_72 = arith.constant dense<0.000000e+00> : vector<64x32xf32>
    %167 = tpu.matmul %165, %166, %cst_72 {dimension_numbers = #tpu.dot_dimension_numbers<[1], [0], [0], [1], [0, 0, 1, 1], [], []>} : vector<64x64xbf16>, vector<64x32xbf16>, vector<64x32xf32> -> vector<64x32xf32>
    %168 = arith.addf %164, %167 : vector<64x32xf32>
    %c160_73 = arith.constant 160 : index
    %c0_74 = arith.constant 0 : index
    %169 = vector.load %arg3[%c160_73, %c0_74] : memref<480x1xf32, #tpu.memory_space<vmem>>, vector<64x1xf32>
    %170 = vector.broadcast %169 : vector<64x1xf32> to vector<64x32xf32>
    %171 = arith.addf %168, %170 : vector<64x32xf32>
    %172 = math.absf %171 : vector<64x32xf32>
    %cst_75 = arith.constant 0.000000e+00 : f32
    %173 = vector.broadcast %cst_75 : f32 to vector<64x32xf32>
    %174 = arith.subf %173, %172 : vector<64x32xf32>
    %175 = math.exp %174 : vector<64x32xf32>
    %cst_76 = arith.constant 0.000000e+00 : f32
    %176 = vector.broadcast %cst_76 : f32 to vector<64x32xf32>
    %177 = arith.cmpf oge, %171, %176 : vector<64x32xf32>
    %cst_77 = arith.constant 1.000000e+00 : f32
    %178 = vector.broadcast %cst_77 : f32 to vector<64x32xf32>
    %179 = arith.select %177, %178, %175 : vector<64x32xi1>, vector<64x32xf32>
    %cst_78 = arith.constant 1.000000e+00 : f32
    %180 = vector.broadcast %cst_78 : f32 to vector<64x32xf32>
    %181 = arith.addf %180, %175 : vector<64x32xf32>
    %182 = tpu.reciprocal %181 {approx = true} : vector<64x32xf32> -> vector<64x32xf32>
    %183 = arith.mulf %179, %182 : vector<64x32xf32>
    %184 = arith.mulf %171, %183 : vector<64x32xf32>
    %185 = arith.truncf %184 : vector<64x32xf32> to vector<64x32xbf16>
    %c672 = arith.constant 672 : index
    %c0_79 = arith.constant 0 : index
    %186 = vector.load %arg2[%c672, %c0_79] : memref<928x64xbf16, #tpu.memory_space<vmem>>, vector<64x64xbf16>
    %cst_80 = arith.constant dense<0.000000e+00> : vector<64x32xf32>
    %187 = tpu.matmul %186, %185, %cst_80 {dimension_numbers = #tpu.dot_dimension_numbers<[1], [0], [0], [1], [0, 0, 1, 1], [], []>} : vector<64x64xbf16>, vector<64x32xbf16>, vector<64x32xf32> -> vector<64x32xf32>
    %c224_81 = arith.constant 224 : index
    %c0_82 = arith.constant 0 : index
    %188 = vector.load %arg3[%c224_81, %c0_82] : memref<480x1xf32, #tpu.memory_space<vmem>>, vector<64x1xf32>
    %189 = vector.broadcast %188 : vector<64x1xf32> to vector<64x32xf32>
    %190 = arith.addf %187, %189 : vector<64x32xf32>
    %c736 = arith.constant 736 : index
    %c0_83 = arith.constant 0 : index
    %191 = vector.load %arg2[%c736, %c0_83] : memref<928x64xbf16, #tpu.memory_space<vmem>>, vector<64x64xbf16>
    %cst_84 = arith.constant dense<0.000000e+00> : vector<64x32xf32>
    %192 = tpu.matmul %191, %185, %cst_84 {dimension_numbers = #tpu.dot_dimension_numbers<[1], [0], [0], [1], [0, 0, 1, 1], [], []>} : vector<64x64xbf16>, vector<64x32xbf16>, vector<64x32xf32> -> vector<64x32xf32>
    %c288_85 = arith.constant 288 : index
    %c0_86 = arith.constant 0 : index
    %193 = vector.load %arg3[%c288_85, %c0_86] : memref<480x1xf32, #tpu.memory_space<vmem>>, vector<64x1xf32>
    %194 = vector.broadcast %193 : vector<64x1xf32> to vector<64x32xf32>
    %195 = arith.addf %192, %194 : vector<64x32xf32>
    %c800 = arith.constant 800 : index
    %c0_87 = arith.constant 0 : index
    %196 = vector.load %arg2[%c800, %c0_87] : memref<928x64xbf16, #tpu.memory_space<vmem>>, vector<64x64xbf16>
    %cst_88 = arith.constant dense<0.000000e+00> : vector<64x32xf32>
    %197 = tpu.matmul %196, %185, %cst_88 {dimension_numbers = #tpu.dot_dimension_numbers<[1], [0], [0], [1], [0, 0, 1, 1], [], []>} : vector<64x64xbf16>, vector<64x32xbf16>, vector<64x32xf32> -> vector<64x32xf32>
    %c352_89 = arith.constant 352 : index
    %c0_90 = arith.constant 0 : index
    %198 = vector.load %arg3[%c352_89, %c0_90] : memref<480x1xf32, #tpu.memory_space<vmem>>, vector<64x1xf32>
    %199 = vector.broadcast %198 : vector<64x1xf32> to vector<64x32xf32>
    %200 = arith.addf %197, %199 : vector<64x32xf32>
    %201 = arith.truncf %190 : vector<64x32xf32> to vector<64x32xbf16>
    %202 = arith.truncf %195 : vector<64x32xf32> to vector<64x32xbf16>
    %cst_91 = arith.constant dense<0.000000e+00> : vector<32x32xf32>
    %203 = tpu.matmul %201, %202, %cst_91 {dimension_numbers = #tpu.dot_dimension_numbers<[0], [0], [1], [1], [0, 1, 1, 1], [], []>} : vector<64x32xbf16>, vector<64x32xbf16>, vector<32x32xf32> -> vector<32x32xf32>
    %cst_92 = arith.constant dense<0xFF800000> : vector<32xf32>
    %204 = vector.multi_reduction <maximumf>, %203, %cst_92 [1] : vector<32x32xf32> to vector<32xf32>
    %205 = vector.shape_cast %204 : vector<32xf32> to vector<32x1xf32>
    %206 = vector.broadcast %205 : vector<32x1xf32> to vector<32x32xf32>
    %207 = arith.subf %203, %206 : vector<32x32xf32>
    %208 = math.exp %207 : vector<32x32xf32>
    %cst_93 = arith.constant dense<0.000000e+00> : vector<32xf32>
    %209 = vector.multi_reduction <add>, %208, %cst_93 [1] : vector<32x32xf32> to vector<32xf32>
    %210 = vector.shape_cast %209 : vector<32xf32> to vector<32x1xf32>
    %211 = vector.broadcast %210 : vector<32x1xf32> to vector<32x32xf32>
    %212 = arith.divf %208, %211 : vector<32x32xf32>
    %213 = arith.truncf %200 : vector<64x32xf32> to vector<64x32xbf16>
    %214 = arith.truncf %212 : vector<32x32xf32> to vector<32x32xbf16>
    %cst_94 = arith.constant dense<0.000000e+00> : vector<64x32xf32>
    %215 = tpu.matmul %213, %214, %cst_94 {dimension_numbers = #tpu.dot_dimension_numbers<[1], [1], [0], [0], [0, 0, 1, 0], [], []>} : vector<64x32xbf16>, vector<32x32xbf16>, vector<64x32xf32> -> vector<64x32xf32>
    %216 = arith.truncf %215 : vector<64x32xf32> to vector<64x32xbf16>
    %c864 = arith.constant 864 : index
    %c0_95 = arith.constant 0 : index
    %217 = vector.load %arg2[%c864, %c0_95] : memref<928x64xbf16, #tpu.memory_space<vmem>>, vector<64x64xbf16>
    %cst_96 = arith.constant dense<0.000000e+00> : vector<64x32xf32>
    %218 = tpu.matmul %217, %216, %cst_96 {dimension_numbers = #tpu.dot_dimension_numbers<[1], [0], [0], [1], [0, 0, 1, 1], [], []>} : vector<64x64xbf16>, vector<64x32xbf16>, vector<64x32xf32> -> vector<64x32xf32>
    %c416_97 = arith.constant 416 : index
    %c0_98 = arith.constant 0 : index
    %219 = vector.load %arg3[%c416_97, %c0_98] : memref<480x1xf32, #tpu.memory_space<vmem>>, vector<64x1xf32>
    %220 = vector.broadcast %219 : vector<64x1xf32> to vector<64x32xf32>
    %221 = arith.addf %218, %220 : vector<64x32xf32>
    %222 = arith.addf %221, %184 : vector<64x32xf32>
    %c0_99 = arith.constant 0 : index
    %c0_100 = arith.constant 0 : index
    %c0_101 = arith.constant 0 : index
    %223 = vector.load %arg4[%c0_99, %c0_100, %c0_101] : memref<1x64x32xf32, #tpu.memory_space<vmem>>, vector<1x64x32xf32>
    %224 = vector.shape_cast %223 : vector<1x64x32xf32> to vector<64x32xf32>
    %225 = vector.shape_cast %222 : vector<64x32xf32> to vector<1x64x32xf32>
    tpu.vector_store %arg4[%c0_99, %c0_100, %c0_101], %225 {strides = array<i32>} : memref<1x64x32xf32, #tpu.memory_space<vmem>>, vector<1x64x32xf32>,
    return
  }
  func.func @transform_0(%arg0: i32) -> (i32, i32, i32) {
    %c0_i32 = arith.constant 0 : i32
    %c0_i32_0 = arith.constant 0 : i32
    %c0_i32_1 = arith.constant 0 : i32
    return %arg0, %c0_i32, %c0_i32_0 : i32, i32, i32
  }
  func.func @transform_1(%arg0: i32) -> (i32, i32) {
    %c0_i32 = arith.constant 0 : i32
    %c0_i32_0 = arith.constant 0 : i32
    %c0_i32_1 = arith.constant 0 : i32
    return %c0_i32, %c0_i32_0 : i32, i32
  }
  func.func @transform_2(%arg0: i32) -> (i32, i32) {
    %c0_i32 = arith.constant 0 : i32
    %c0_i32_0 = arith.constant 0 : i32
    %c0_i32_1 = arith.constant 0 : i32
    return %c0_i32, %c0_i32_0 : i32, i32
  }
  func.func @transform_3(%arg0: i32) -> (i32, i32, i32) {
    %c0_i32 = arith.constant 0 : i32
    %c0_i32_0 = arith.constant 0 : i32
    %c0_i32_1 = arith.constant 0 : i32
    return %arg0, %c0_i32, %c0_i32_0 : i32, i32, i32
  }
}

</mosaic_0001>

<bundles_post_ra>
// kernel: cnn1d_low_forward.1
= control target key start
LH: loop header
LB: loop body
LE: loop exit
PB: predicated region body
PF: predicated region fallthrough
CT: control target
= control target key end

     0   :  { %s2927_s12 = smov 0   ;;  %s3574_s0 = inlined_call_operand.vmem [shape: f32[2,1,48], index: 0, kind: input, shape index: {}]   ;;  %s3575_s1 = inlined_call_operand.vmem [shape: bf16[928,64], index: 1, kind: input, shape index: {}]   ;;  %s3576_s2 = inlined_call_operand.vmem [shape: f32[480,1], index: 2, kind: input, shape index: {}]   ;;  %s3577_s3 = inlined_call_operand.vmem [shape: f32[2,64,32], index: 3, kind: output, shape index: {}]  }
   0x1 LB: > { %s2383_s13 = sadd.s32 4294967295, %s2899_s12   ;;  %p2387_p0 = scmp.ge.s32.totalorder %s2899_s12, 1  ;;  %s2899_s12 = sphi %s2927_s12, %s13_s12  }
   0x2   : > { %p135_p1 = scmp.lt.s32.totalorder %s2899_s12, 3 }
   0x4   : > { %p136_p2 = pnand %p2387_p0, %p135_p1 }
   0x5   : > { %p157_p3 = scmp.lt.s32.totalorder (!%p136_p2), %s2383_s13, 1  ;;  %s2901_s17 = smov (!%p136_p2), 127  }
   0x6   : > { %139 = sbr.rel (%p136_p2) target bundleno = 3143 (0xc47), region = 32  ;;  %s2902_s18 = smov (!%p136_p2), 125  }
   0x7   : > { %s2903_s19 = smov (!%p136_p2), 126   ;;  %s2904_s20 = smov (!%p136_p2), 124  }
   0xb   : > { %s3583_s13 = smov (!%p157_p3, %s2383_s13), 1  ;;  %v192_v1 = vld [vmem:[%s3576_s2] sm:$0xff]  ;;  %v2905_v2 = vmov 0   ;;  %v193_v3 = vld [vmem:[%s3576_s2 + $0x8] sm:$0xff]  ;;  %vm181_vm0 = vcmask 1040384   ;;  %vm183_vm1 = vcmask 1041408  }
   0xc   : > { %s159_s16 = scalar_lea.vmem %s3574_s0, %s3583_s13  ;;  %2761 = vset.pattern.permute.xlu2 %v2905_v2  ;;  %2762 = vset.pattern.permute.xlu1 %v2905_v2  ;;  %vm185_vm2 = vcmask 1042432   ;;  %vm187_vm3 = vcmask 1043456   ;;  %v2906_v10 = vmov 65535   ;;  %v2689_v18 = vld [vmem:[%s3575_s1] sm:$0xff]  ;;  %vm209_vm4 = vcmask 39936   ;;  %v400_v48 = vld [vmem:[%s3576_s2 + $0x18] sm:$0xff] }
   0xd   : > { %v2764_v0 = vld [vmem:[%s159_s16] ss:$0 sm:$0xff]  ;;  %196 = vperm.xlu2 %2761, %v192_v1   ;;  %2763 = vset.pattern.permute.xlu0 %v2905_v2  ;;  %v213_v11 = vsel %vm183_vm1, 4294967295, %v2906_v10  ;;  %v570_v49 = vld [vmem:[%s3576_s2 + $0x30] sm:$0xff]  ;;  %v569_v50 = vld [vmem:[%s3576_s2 + $0x28] sm:$0xff]  ;;  %vm271_vm7 = vcmask 130048  }
   0xe   : > { %169 = vrot.lane.b32.xlu0 %v2764_v0, %s2901_s17  ;;  %175 = vrot.lane.b32.xlu1 %v2764_v0, %s2902_s18  ;;  %v166_v6 = vld [vmem:[%s159_s16] sm:$0x1]  ;;  %v214_v15 = vsel %vm185_vm2, %v213_v11, 0  ;;  %v2691_v53 = vld [vmem:[%s3575_s1 + $0x10] sm:$0xff]  ;;  %vm674_vm14 = vcmask 261120   ;;  %s2688_s14 = sshll.u32 %s3583_s13, 6 }
   0xf   : > { %v2693_v55 = vld [vmem:[%s3575_s1 + $0x20] sm:$0xff]  ;;  %v2690_v56 = vld [vmem:[%s3575_s1 + $0x8] sm:$0xff]  ;;  %v399_v58 = vld [vmem:[%s3576_s2 + $0x10] sm:$0xff] }
  0x10   : > { %v2692_v59 = vld [vmem:[%s3575_s1 + $0x18] sm:$0xff]  ;;  %v2694_v60 = vld [vmem:[%s3575_s1 + $0x28] sm:$0xff] }
  0x15   : > { %201 = vperm.xlu2 %2761, %v193_v3  }
  0x16   : > { %172 = vrot.lane.b32.xlu0 %v2764_v0, %s2903_s19  ;;  %178 = vrot.lane.b32.xlu1 %v2764_v0, %s2904_s20 }
  0x67   : > { %v197_v19 = vpop.permute.xlu2 %196 }
  0x6f   : > { %v202_v25 = vpop.permute.xlu2 %201 }
  0x80   : > { %v170_v4 = vpop.permute.xlu0 %169  ;;  %v176_v5 = vpop.permute.xlu1 %175 }
  0x81   : > { %v182_v7 = vsel %vm181_vm0, %v166_v6, %v170_v4 }
  0x88   : > { %v173_v8 = vpop.permute.xlu0 %172  ;;  %v179_v9 = vpop.permute.xlu1 %178 }
  0x89   : > { %v184_v12 = vsel %vm183_vm1, %v182_v7, %v173_v8 }
  0x8a   : > { %v186_v13 = vsel %vm185_vm2, %v184_v12, %v176_v5 }
  0x8b   : > { %v188_v14 = vsel %vm187_vm3, %v186_v13, %v179_v9 }
  0x8c   : > { %v191_v16 = vpack.c.bf16 %v188_v14, %v188_v14 }
  0x8e   : > { %v216_v17 = vand.u32 %v214_v15, %v191_v16 }
  0x90   : > { %225 = vmatpush.bf16.msra.mxu0 %v216_v17 }
  0x93   : > { %2394 = vmatmul.msk.bf16.vlgmr.msra.gmra.mxu0 %vm209_vm4, %v2689_v18 }
 0x110   : > { %v227_v20 = vpop.f32.mrf.mxu0 }
 0x111   : > { %v228_v21 = vadd.f32 %v227_v20, %v197_v19 }
 0x113   : > { %v232_v22 = vand.u32 2147483647, %v228_v21  ;;  %vm240_vm5 = vcmp.ge.f32.partialorder %v228_v21, 0.0 }
 0x115   : > { %v234_v23 = vsub.f32 0.0, %v232_v22 }
 0x117   : > { %v236_v24 = vmul.f32 1.442695, %v234_v23 }
 0x118   : > { %v229_v26 = vpop.f32.mrf.mxu0 }
 0x119   : > { %2765 = vpow2.f32 %v236_v24  ;;  %v230_v27 = vadd.f32 %v229_v26, %v202_v25 }
 0x11b   : > { %v233_v28 = vand.u32 2147483647, %v230_v27  ;;  %vm241_vm6 = vcmp.ge.f32.partialorder %v230_v27, 0.0 }
 0x11d   : > { %v235_v29 = vsub.f32 0.0, %v233_v28 }
 0x11f   : > { %v2766_v30 = vpop.eup %2765  ;;  %v238_v31 = vmul.f32 1.442695, %v235_v29 }
 0x120   : > { %v244_v32 = vadd.f32 1.0, %v2766_v30  ;;  %v242_v36 = vsel %vm240_vm5, 1.0, %v2766_v30 }
 0x121   : > { %2767 = vpow2.f32 %v238_v31 }
 0x122   : > { %2769 = vrcp.f32 %v244_v32 }
 0x127   : > { %v2768_v33 = vpop.eup %2767 }
 0x128   : > { %v2770_v34 = vpop.eup %2769  ;;  %v245_v35 = vadd.f32 1.0, %v2768_v33  ;;  %v243_v40 = vsel %vm241_vm6, 1.0, %v2768_v33 }
 0x129   : > { %v248_v37 = vmul.f32 %v2770_v34, %v242_v36 }
 0x12a   : > { %2771 = vrcp.f32 %v245_v35 }
 0x12b   : > { %v250_v38 = vmul.f32 %v248_v37, %v228_v21 }
 0x12d   : > { %v252_v42 = vpack.c.bf16 %v250_v38, %v250_v38 }
 0x12f   : > { %v265_v45 = vunpack.c.l.b16 %v252_v42  ;;  %v2695_v42 = vld [vmem:[%s3575_s1 + $0x30] sm:$0xff] }
 0x130   : > { %v2772_v39 = vpop.eup %2771 }
 0x131   : > { %v249_v41 = vmul.f32 %v2772_v39, %v243_v40 }
 0x133   : > { %v251_v43 = vmul.f32 %v249_v41, %v230_v27 }
 0x135   : > { %v253_v44 = vpack.c.bf16 %v251_v43, %v251_v43  ;;  %v568_v43 = vld [vmem:[%s3576_s2 + $0x20] sm:$0xff] }
 0x137   : > { %v266_v46 = vunpack.c.l.b16 %v253_v44  ;;  %v2696_v44 = vld [vmem:[%s3575_s1 + $0x38] sm:$0xff] }
 0x139   : > { %v267_v47 = vpack.c.b16 %v266_v46, %v265_v45  ;;  %v571_v45 = vld [vmem:[%s3576_s2 + $0x38] sm:$0xff] }
 0x13b   : > { %348 = vrot.lane.b32.xlu2 %v267_v47, %s2902_s18  ;;  %319 = vrot.lane.b32.xlu1 %v267_v47, %s2903_s19  ;;  %s3545_s18 = scalar_lea.vmem %s3577_s3, %s2688_s14 }
 0x13c   : > { %268 = vrot.lane.b32.xlu0 %v267_v47, %s2901_s17 }
 0x143   : > { %408 = vperm.xlu2 %2761, %v400_v48   ;;  %403 = vperm.xlu1 %2762, %v399_v58   ;;  %v2697_v48 = vld [vmem:[%s3575_s1 + $0x40] sm:$0xff] }
 0x144   : > { %377 = vrot.lane.b32.xlu0 %v267_v47, %s2904_s20 }
 0x14b   : > { %584 = vperm.xlu2 %2761, %v570_v49   ;;  %v2699_v49 = vld [vmem:[%s3575_s1 + $0x50] sm:$0xff] }
 0x153   : > { %579 = vperm.xlu2 %2761, %v569_v50   ;;  %v2698_v50 = vld [vmem:[%s3575_s1 + $0x48] sm:$0xff] }
 0x195   : > { %v349_v51 = vpop.permute.xlu2 %348 }
 0x196   : > { %361 = vmatpush.bf16.msrb.mxu0 %v349_v51  ;;  %v2700_v51 = vld [vmem:[%s3575_s1 + $0x58] sm:$0xff] }
 0x199   : > { %2414 = vmatmul.msk.bf16.vlgmr.msrb.gmra.mxu0 %vm271_vm7, %v2693_v55 }
 0x19d   : > { %v409_v20 = vpop.permute.xlu2 %408 }
 0x1ad   : > { %v320_v54 = vpop.permute.xlu1 %319 }
 0x1ae   : > { %v269_v52 = vpop.permute.xlu0 %268 }
 0x1af   : > { %282 = vmatpush.bf16.msra.mxu1 %v269_v52 }
 0x1b2   : > { %2399 = vmatmul.msk.bf16.vlgmr.msra.gmra.mxu1 %vm271_vm7, %v2691_v53 }
 0x1b3   : > { %305 = vmatpush.bf16.msrb.mxu1 %v267_v47 }
 0x1b5   : > { %v404_v8 = vpop.permute.xlu1 %403 }
 0x1b6   : > { %v378_v57 = vpop.permute.xlu0 %377 }
 0x1b7   : > { %332 = vmatpush.bf16.msra.mxu1 %v320_v54 }
 0x1c2   : > { %2404 = vmatmul.msk.bf16.vlgmr.msrb.gmra.mxu1 %vm271_vm7, %v2690_v56  ;;  %v585_v56 = vpop.permute.xlu2 %584 }
 0x1c3   : > { %390 = vmatpush.bf16.msrb.mxu1 %v378_v57 }
 0x1d2   : > { %2409 = vmatmul.msk.bf16.vlgmr.msra.gmra.mxu1 %vm271_vm7, %v2692_v59 }
 0x1e2   : > { %2419 = vmatmul.msk.bf16.vlgmr.msrb.gmra.mxu1 %vm271_vm7, %v2694_v60 }
 0x216   : > { %v363_v4 = vpop.f32.mrf.mxu0 }
 0x21e   : > { %v365_v13 = vpop.f32.mrf.mxu0 }
 0x22f   : > { %v284_v61 = vpop.f32.mrf.mxu1 }
 0x237   : > { %v286_v62 = vpop.f32.mrf.mxu1 }
 0x23f   : > { %v307_v63 = vpop.f32.mrf.mxu1 }
 0x240   : > { %v308_v3 = vadd.f32 %v307_v63, %v284_v61 }
 0x247   : > { %v309_v0 = vpop.f32.mrf.mxu1 }
 0x248   : > { %v310_v9 = vadd.f32 %v309_v0, %v286_v62 }
 0x24f   : > { %v334_v1 = vpop.f32.mrf.mxu1 }
 0x250   : > { %v339_v5 = vadd.f32 %v334_v1, %v308_v3 }
 0x252   : > { %v368_v6 = vadd.f32 %v363_v4, %v339_v5  ;;  %v580_v4 = vpop.permute.xlu2 %579 }
 0x257   : > { %v336_v2 = vpop.f32.mrf.mxu1 }
 0x258   : > { %v340_v11 = vadd.f32 %v336_v2, %v310_v9 }
 0x25a   : > { %v369_v15 = vadd.f32 %v365_v13, %v340_v11 }
 0x25f   : > { %v392_v7 = vpop.f32.mrf.mxu1 }
 0x260   : > { %v397_v10 = vadd.f32 %v392_v7, %v368_v6 }
 0x262   : > { %v411_v12 = vadd.f32 %v404_v8, %v397_v10 }
 0x264   : > { %v413_v14 = vand.u32 2147483647, %v411_v12  ;;  %vm421_vm8 = vcmp.ge.f32.partialorder %v411_v12, 0.0 }
 0x266   : > { %v415_v16 = vsub.f32 0.0, %v413_v14 }
 0x267   : > { %v394_v17 = vpop.f32.mrf.mxu1 }
 0x268   : > { %v417_v18 = vmul.f32 1.442695, %v415_v16  ;;  %v398_v19 = vadd.f32 %v394_v17, %v369_v15 }
 0x26a   : > { %2773 = vpow2.f32 %v417_v18  ;;  %v412_v21 = vadd.f32 %v409_v20, %v398_v19 }
 0x26c   : > { %v414_v22 = vand.u32 2147483647, %v412_v21  ;;  %vm422_vm9 = vcmp.ge.f32.partialorder %v412_v21, 0.0 }
 0x26e   : > { %v416_v23 = vsub.f32 0.0, %v414_v22 }
 0x270   : > { %v2774_v24 = vpop.eup %2773  ;;  %v419_v25 = vmul.f32 1.442695, %v416_v23 }
 0x271   : > { %v425_v26 = vadd.f32 1.0, %v2774_v24  ;;  %v423_v30 = vsel %vm421_vm8, 1.0, %v2774_v24 }
 0x272   : > { %2775 = vpow2.f32 %v419_v25 }
 0x273   : > { %2777 = vrcp.f32 %v425_v26 }
 0x278   : > { %v2776_v27 = vpop.eup %2775 }
 0x279   : > { %v2778_v28 = vpop.eup %2777  ;;  %v426_v29 = vadd.f32 1.0, %v2776_v27  ;;  %v424_v34 = vsel %vm422_vm9, 1.0, %v2776_v27 }
 0x27a   : > { %v429_v31 = vmul.f32 %v2778_v28, %v423_v30 }
 0x27b   : > { %2779 = vrcp.f32 %v426_v29 }
 0x27c   : > { %v431_v32 = vmul.f32 %v429_v31, %v411_v12 }
 0x27e   : > { %v433_v36 = vpack.c.bf16 %v431_v32, %v431_v32 }
 0x280   : > { %v455_v39 = vunpack.c.l.b16 %v433_v36 }
 0x281   : > { %v2780_v33 = vpop.eup %2779 }
 0x282   : > { %v430_v35 = vmul.f32 %v2780_v33, %v424_v34 }
 0x284   : > { %v432_v37 = vmul.f32 %v430_v35, %v412_v21 }
 0x286   : > { %v434_v38 = vpack.c.bf16 %v432_v37, %v432_v37 }
 0x288   : > { %v456_v40 = vunpack.c.l.b16 %v434_v38 }
 0x28a   : > { %v457_v41 = vpack.c.b16 %v456_v40, %v455_v39 }
 0x28c   : > { %536 = vrot.lane.b32.xlu1 %v457_v41, %s2903_s19  ;;  %458 = vrot.lane.b32.xlu0 %v457_v41, %s2901_s17 }
 0x28d   : > { %510 = vmatpush.bf16.msra.mxu3 %v457_v41 }
 0x290   : > { %2438 = vmatmul.msk.bf16.vlgmr.msra.gmra.mxu3 %vm271_vm7, %v2695_v42 }
 0x294   : > { %574 = vperm.xlu1 %2762, %v568_v43   ;;  %589 = vperm.xlu0 %2763, %v571_v45  }
 0x2a0   : > { %2439 = vmatmul.msk.bf16.gmra.mxu3 %vm271_vm7, %v2696_v44 }
 0x2fe   : > { %v537_v46 = vpop.permute.xlu1 %536  ;;  %v459_v47 = vpop.permute.xlu0 %458 }
 0x2ff   : > { %474 = vmatpush.bf16.msra.mxu2 %v459_v47  ;;  %552 = vmatpush.bf16.msra.mxu0 %v537_v46 }
 0x302   : > { %2428 = vmatmul.msk.bf16.vlgmr.msra.gmra.mxu2 %vm271_vm7, %v2697_v48  ;;  %2448 = vmatmul.msk.bf16.vlgmr.msra.gmra.mxu0 %vm271_vm7, %v2699_v49 }
 0x306   : > { %v575_v58 = vpop.permute.xlu1 %574  ;;  %v590_v23 = vpop.permute.xlu0 %589 }
 0x312   : > { %2429 = vmatmul.msk.bf16.gmra.mxu2 %vm271_vm7, %v2698_v50  ;;  %2449 = vmatmul.msk.bf16.gmra.mxu0 %vm271_vm7, %v2700_v51 }
 0x313   : > { %v512_v52 = vpop.f32.mrf.mxu3 }
 0x31b   : > { %v514_v59 = vpop.f32.mrf.mxu3 }
 0x323   : > { %v517_v6 = vpop.f32.mrf.mxu3 }
 0x32b   : > { %v519_v18 = vpop.f32.mrf.mxu3 }
 0x37f   : > { %v554_v53 = vpop.f32.mrf.mxu0 }
 0x385   : > { %v476_v54 = vpop.f32.mrf.mxu2 }
 0x386   : > { %v513_v55 = vadd.f32 %v512_v52, %v476_v54 }
 0x387   : > { %v556_v61 = vpop.f32.mrf.mxu0 }
 0x388   : > { %v564_v57 = vadd.f32 %v554_v53, %v513_v55  ;;  %v789_v55 = vld [vmem:[%s3576_s2 + $0x58] sm:$0xff] }
 0x38a   : > { %v592_v60 = vadd.f32 %v575_v58, %v564_v57 }
 0x38c   : > { %v596_v62 = vand.u32 2147483647, %v592_v60  ;;  %vm612_vm10 = vcmp.ge.f32.partialorder %v592_v60, 0.0 }
 0x38d   : > { %v478_v63 = vpop.f32.mrf.mxu2 }
 0x38e   : > { %v600_v0 = vsub.f32 0.0, %v596_v62  ;;  %v515_v1 = vadd.f32 %v514_v59, %v478_v63  ;;  %v788_v63 = vld [vmem:[%s3576_s2 + $0x50] sm:$0xff] }
 0x38f   : > { %v559_v8 = vpop.f32.mrf.mxu0 }
 0x390   : > { %v604_v2 = vmul.f32 1.442695, %v600_v0  ;;  %v565_v3 = vadd.f32 %v556_v61, %v515_v1  ;;  %v787_v0 = vld [vmem:[%s3576_s2 + $0x48] sm:$0xff]  ;;  %v786_v1 = vld [vmem:[%s3576_s2 + $0x40] sm:$0xff] }
 0x392   : > { %2781 = vpow2.f32 %v604_v2  ;;  %v593_v5 = vadd.f32 %v580_v4, %v565_v3  ;;  %v2701_v2 = vld [vmem:[%s3575_s1 + $0x60] sm:$0xff]  ;;  %v2702_v4 = vld [vmem:[%s3575_s1 + $0x68] sm:$0xff] }
 0x394   : > { %v597_v7 = vand.u32 2147483647, %v593_v5  ;;  %vm613_vm11 = vcmp.ge.f32.partialorder %v593_v5, 0.0 }
 0x395   : > { %v481_v9 = vpop.f32.mrf.mxu2 }
 0x396   : > { %v601_v10 = vsub.f32 0.0, %v597_v7  ;;  %v518_v11 = vadd.f32 %v517_v6, %v481_v9  ;;  %v2705_v7 = vld [vmem:[%s3575_s1 + $0x80] sm:$0xff]  ;;  %v2703_v9 = vld [vmem:[%s3575_s1 + $0x70] sm:$0xff] }
 0x397   : > { %v561_v22 = vpop.f32.mrf.mxu0 }
 0x398   : > { %v2782_v12 = vpop.eup %2781  ;;  %v606_v13 = vmul.f32 1.442695, %v601_v10  ;;  %v566_v14 = vadd.f32 %v559_v8, %v518_v11  ;;  %v2706_v10 = vld [vmem:[%s3575_s1 + $0x88] sm:$0xff]  ;;  %v2704_v11 = vld [vmem:[%s3575_s1 + $0x78] sm:$0xff] }
 0x399   : > { %v620_v15 = vadd.f32 1.0, %v2782_v12  ;;  %v616_v30 = vsel %vm612_vm10, 1.0, %v2782_v12 }
 0x39a   : > { %2783 = vpow2.f32 %v606_v13  ;;  %v594_v16 = vadd.f32 %v585_v56, %v566_v14 }
 0x39b   : > { %2785 = vrcp.f32 %v620_v15 }
 0x39c   : > { %v598_v17 = vand.u32 2147483647, %v594_v16  ;;  %vm614_vm12 = vcmp.ge.f32.partialorder %v594_v16, 0.0 }
 0x39d   : > { %v483_v19 = vpop.f32.mrf.mxu2 }
 0x39e   : > { %v602_v20 = vsub.f32 0.0, %v598_v17  ;;  %v520_v21 = vadd.f32 %v519_v18, %v483_v19 }
 0x3a0   : > { %v2784_v24 = vpop.eup %2783  ;;  %v608_v25 = vmul.f32 1.442695, %v602_v20  ;;  %v567_v26 = vadd.f32 %v561_v22, %v520_v21 }
 0x3a1   : > { %v2786_v27 = vpop.eup %2785  ;;  %v621_v28 = vadd.f32 1.0, %v2784_v24  ;;  %v617_v38 = vsel %vm613_vm11, 1.0, %v2784_v24  ;;  %vm1309_vm11 = vcmask 523264  }
 0x3a2   : > { %2787 = vpow2.f32 %v608_v25  ;;  %v595_v29 = vadd.f32 %v590_v23, %v567_v26  ;;  %v628_v32 = vmul.f32 %v2786_v27, %v616_v30 }
 0x3a3   : > { %2789 = vrcp.f32 %v621_v28 }
 0x3a4   : > { %v599_v31 = vand.u32 2147483647, %v595_v29  ;;  %v632_v36 = vmul.f32 %v628_v32, %v592_v60  ;;  %vm615_vm13 = vcmp.ge.f32.partialorder %v595_v29, 0.0 }
 0x3a6   : > { %v603_v33 = vsub.f32 0.0, %v599_v31  ;;  %v636_v42 = vpack.c.bf16 %v632_v36, %v632_v36 }
 0x3a8   : > { %v2788_v34 = vpop.eup %2787  ;;  %v610_v35 = vmul.f32 1.442695, %v603_v33  ;;  %v662_v45 = vunpack.c.l.b16 %v636_v42 }
 0x3a9   : > { %v2790_v37 = vpop.eup %2789  ;;  %v622_v39 = vadd.f32 1.0, %v2788_v34  ;;  %v618_v50 = vsel %vm614_vm12, 1.0, %v2788_v34 }
 0x3aa   : > { %2791 = vpow2.f32 %v610_v35  ;;  %v629_v40 = vmul.f32 %v2790_v37, %v617_v38 }
 0x3ab   : > { %2793 = vrcp.f32 %v622_v39 }
 0x3ac   : > { %v633_v41 = vmul.f32 %v629_v40, %v593_v5 }
 0x3ae   : > { %v637_v43 = vpack.c.bf16 %v633_v41, %v633_v41 }
 0x3b0   : > { %v2792_v44 = vpop.eup %2791  ;;  %v663_v46 = vunpack.c.l.b16 %v637_v43 }
 0x3b1   : > { %v2794_v47 = vpop.eup %2793  ;;  %v623_v48 = vadd.f32 1.0, %v2792_v44  ;;  %v619_v54 = vsel %vm615_vm13, 1.0, %v2792_v44 }
 0x3b2   : > { %v666_v49 = vpack.c.b16 %v663_v46, %v662_v45  ;;  %v630_v51 = vmul.f32 %v2794_v47, %v618_v50 }
 0x3b3   : > { %2795 = vrcp.f32 %v623_v48 }
 0x3b4   : > { %751 = vrot.lane.b32.xlu0 %v666_v49, %s2903_s19  ;;  %v634_v52 = vmul.f32 %v630_v51, %v594_v16 }
 0x3b6   : > { %v638_v58 = vpack.c.bf16 %v634_v52, %v634_v52 }
 0x3b8   : > { %v664_v60 = vunpack.c.l.b16 %v638_v58 }
 0x3b9   : > { %v2796_v53 = vpop.eup %2795 }
 0x3ba   : > { %v631_v56 = vmul.f32 %v2796_v53, %v619_v54 }
 0x3bc   : > { %v635_v57 = vmul.f32 %v631_v56, %v595_v29  ;;  %807 = vperm.xlu0 %2763, %v789_v55  }
 0x3be   : > { %v639_v59 = vpack.c.bf16 %v635_v57, %v635_v57 }
 0x3c0   : > { %v665_v61 = vunpack.c.l.b16 %v639_v59 }
 0x3c2   : > { %v667_v62 = vpack.c.b16 %v665_v61, %v664_v60 }
 0x3c4   : > { %670 = vrot.lane.b32.xlu2 %v667_v62, %s2901_s17  ;;  %753 = vrot.lane.b32.xlu1 %v667_v62, %s2903_s19 }
 0x3c5   : > { %724 = vmatpush.bf16.msrb.mxu2 %v667_v62 }
 0x3c9   : > { %725 = vmatpush.bf16.msrb.mxu2 %v666_v49 }
 0x3cc   : > { %802 = vperm.xlu2 %2761, %v788_v63   ;;  %668 = vrot.lane.b32.xlu1 %v666_v49, %s2901_s17 }
 0x3cd   : > { %2468 = vmatmul.msk.bf16.vlgmr.msrb.gmra.mxu2 %vm674_vm14, %v2701_v2 }
 0x3d4   : > { %797 = vperm.xlu2 %2761, %v787_v0   ;;  %792 = vperm.xlu1 %2762, %v786_v1  }
 0x3dd   : > { %2469 = vmatmul.msk.bf16.gmra.mxu2 %vm674_vm14, %v2702_v4 }
 0x41e   : > { %v671_v3 = vpop.permute.xlu2 %670 }
 0x41f   : > { %687 = vmatpush.bf16.msra.mxu1 %v671_v3 }
 0x426   : > { %v752_v6 = vpop.permute.xlu0 %751  ;;  %v803_v15 = vpop.permute.xlu2 %802 }
 0x42e   : > { %v798_v28 = vpop.permute.xlu2 %797  ;;  %v808_v51 = vpop.permute.xlu0 %807 }
 0x436   : > { %v754_v5 = vpop.permute.xlu1 %753 }
 0x437   : > { %769 = vmatpush.bf16.msrb.mxu3 %v754_v5 }
 0x43b   : > { %770 = vmatpush.bf16.msrb.mxu3 %v752_v6 }
 0x43e   : > { %v669_v8 = vpop.permute.xlu1 %668  ;;  %2478 = vmatmul.msk.bf16.vlgmr.msrb.gmra.mxu3 %vm674_vm14, %v2705_v7 }
 0x43f   : > { %688 = vmatpush.bf16.msra.mxu1 %v669_v8 }
 0x442   : > { %2458 = vmatmul.msk.bf16.vlgmr.msra.gmra.mxu1 %vm674_vm14, %v2703_v9 }
 0x446   : > { %v793_v18 = vpop.permute.xlu1 %792 }
 0x44e   : > { %2479 = vmatmul.msk.bf16.gmra.mxu3 %vm674_vm14, %v2706_v10 }
 0x450   : > { %v727_v12 = vpop.f32.mrf.mxu2 }
 0x452   : > { %2459 = vmatmul.msk.bf16.gmra.mxu1 %vm674_vm14, %v2704_v11 }
 0x458   : > { %v729_v19 = vpop.f32.mrf.mxu2 }
 0x460   : > { %v732_v30 = vpop.f32.mrf.mxu2 }
 0x468   : > { %v734_v42 = vpop.f32.mrf.mxu2 }
 0x4bf   : > { %v690_v13 = vpop.f32.mrf.mxu1 }
 0x4c0   : > { %v728_v14 = vadd.f32 %v727_v12, %v690_v13 }
 0x4c1   : > { %v772_v16 = vpop.f32.mrf.mxu3 }
 0x4c2   : > { %v782_v17 = vadd.f32 %v772_v16, %v728_v14 }
 0x4c4   : > { %v810_v20 = vadd.f32 %v793_v18, %v782_v17 }
 0x4c6   : > { %v814_v21 = vand.u32 2147483647, %v810_v20  ;;  %vm830_vm15 = vcmp.ge.f32.partialorder %v810_v20, 0.0 }
 0x4c7   : > { %v692_v22 = vpop.f32.mrf.mxu1 }
 0x4c8   : > { %v818_v23 = vsub.f32 0.0, %v814_v21  ;;  %v730_v24 = vadd.f32 %v729_v19, %v692_v22 }
 0x4c9   : > { %v774_v25 = vpop.f32.mrf.mxu3 }
 0x4ca   : > { %v822_v26 = vmul.f32 1.442695, %v818_v23  ;;  %v783_v27 = vadd.f32 %v774_v25, %v730_v24  ;;  %v1099_v23 = vld [vmem:[%s3576_s2 + $0x70] sm:$0xff]  ;;  %v1098_v25 = vld [vmem:[%s3576_s2 + $0x68] sm:$0xff] }
 0x4cb   : > { %v1103_v24 = vld [vmem:[%s3576_s2 + $0x90] sm:$0xff] }
 0x4cc   : > { %2797 = vpow2.f32 %v822_v26  ;;  %v811_v29 = vadd.f32 %v798_v28, %v783_v27  ;;  %v1102_v26 = vld [vmem:[%s3576_s2 + $0x88] sm:$0xff]  ;;  %v1101_v27 = vld [vmem:[%s3576_s2 + $0x80] sm:$0xff] }
 0x4cd   : > { %v1097_v28 = vld [vmem:[%s3576_s2 + $0x60] sm:$0xff] }
 0x4ce   : > { %v815_v31 = vand.u32 2147483647, %v811_v29  ;;  %vm831_vm0 = vcmp.ge.f32.partialorder %v811_v29, 0.0 }
 0x4cf   : > { %v695_v32 = vpop.f32.mrf.mxu1 }
 0x4d0   : > { %v819_v33 = vsub.f32 0.0, %v815_v31  ;;  %v733_v34 = vadd.f32 %v732_v30, %v695_v32  ;;  %v2707_v30 = vld [vmem:[%s3575_s1 + $0x90] sm:$0xff]  ;;  %v2708_v31 = vld [vmem:[%s3575_s1 + $0x98] sm:$0xff]  ;;  %v2709_v32 = vld [vmem:[%s3575_s1 + $0xa0] sm:$0xff] }
 0x4d1   : > { %v777_v35 = vpop.f32.mrf.mxu3 }
 0x4d2   : > { %v2798_v36 = vpop.eup %2797  ;;  %v824_v37 = vmul.f32 1.442695, %v819_v33  ;;  %v784_v38 = vadd.f32 %v777_v35, %v733_v34 }
 0x4d3   : > { %v838_v39 = vadd.f32 1.0, %v2798_v36  ;;  %v834_v54 = vsel %vm830_vm15, 1.0, %v2798_v36  ;;  %v2715_v36 = vld [vmem:[%s3575_s1 + $0xd0] sm:$0xff] }
 0x4d4   : > { %2799 = vpow2.f32 %v824_v37  ;;  %v812_v40 = vadd.f32 %v803_v15, %v784_v38  ;;  %v1104_v15 = vld [vmem:[%s3576_s2 + $0x98] sm:$0xff]  ;;  %v2711_v38 = vld [vmem:[%s3575_s1 + $0xb0] sm:$0xff] }
 0x4d5   : > { %2801 = vrcp.f32 %v838_v39  ;;  %v2710_v39 = vld [vmem:[%s3575_s1 + $0xa8] sm:$0xff] }
 0x4d6   : > { %v816_v41 = vand.u32 2147483647, %v812_v40  ;;  %vm832_vm1 = vcmp.ge.f32.partialorder %v812_v40, 0.0 }
 0x4d7   : > { %v697_v43 = vpop.f32.mrf.mxu1 }
 0x4d8   : > { %v820_v44 = vsub.f32 0.0, %v816_v41  ;;  %v735_v45 = vadd.f32 %v734_v42, %v697_v43  ;;  %v2712_v41 = vld [vmem:[%s3575_s1 + $0xb8] sm:$0xff]  ;;  %v2717_v42 = vld [vmem:[%s3575_s1 + $0xe0] sm:$0xff] }
 0x4d9   : > { %v779_v46 = vpop.f32.mrf.mxu3  ;;  %v2713_v43 = vld [vmem:[%s3575_s1 + $0xc0] sm:$0xff] }
 0x4da   : > { %v2800_v47 = vpop.eup %2799  ;;  %v826_v48 = vmul.f32 1.442695, %v820_v44  ;;  %v785_v49 = vadd.f32 %v779_v46, %v735_v45  ;;  %v2718_v44 = vld [vmem:[%s3575_s1 + $0xe8] sm:$0xff] }
 0x4db   : > { %v2802_v50 = vpop.eup %2801  ;;  %v839_v52 = vadd.f32 1.0, %v2800_v47  ;;  %v835_v62 = vsel %vm831_vm0, 1.0, %v2800_v47  ;;  %v2714_v45 = vld [vmem:[%s3575_s1 + $0xc8] sm:$0xff] }
 0x4dc   : > { %2803 = vpow2.f32 %v826_v48  ;;  %v813_v53 = vadd.f32 %v808_v51, %v785_v49  ;;  %v846_v56 = vmul.f32 %v2802_v50, %v834_v54 }
 0x4dd   : > { %2805 = vrcp.f32 %v839_v52 }
 0x4de   : > { %v817_v55 = vand.u32 2147483647, %v813_v53  ;;  %v850_v60 = vmul.f32 %v846_v56, %v810_v20  ;;  %vm833_vm2 = vcmp.ge.f32.partialorder %v813_v53, 0.0 }
 0x4e0   : > { %v821_v57 = vsub.f32 0.0, %v817_v55  ;;  %v854_v2 = vpack.c.bf16 %v850_v60, %v850_v60 }
 0x4e2   : > { %v2804_v58 = vpop.eup %2803  ;;  %v828_v59 = vmul.f32 1.442695, %v821_v57  ;;  %v898_v5 = vunpack.c.l.b16 %v854_v2 }
 0x4e3   : > { %v2806_v61 = vpop.eup %2805  ;;  %v840_v63 = vadd.f32 1.0, %v2804_v58  ;;  %v836_v10 = vsel %vm832_vm1, 1.0, %v2804_v58 }
 0x4e4   : > { %2807 = vpow2.f32 %v828_v59  ;;  %v847_v0 = vmul.f32 %v2806_v61, %v835_v62 }
 0x4e5   : > { %2809 = vrcp.f32 %v840_v63 }
 0x4e6   : > { %v851_v1 = vmul.f32 %v847_v0, %v811_v29  ;;  %v1100_v29 = vld [vmem:[%s3576_s2 + $0x78] sm:$0xff] }
 0x4e8   : > { %v855_v3 = vpack.c.bf16 %v851_v1, %v851_v1 }
 0x4ea   : > { %v2808_v4 = vpop.eup %2807  ;;  %v899_v6 = vunpack.c.l.b16 %v855_v3 }
 0x4eb   : > { %v2810_v7 = vpop.eup %2809  ;;  %v841_v8 = vadd.f32 1.0, %v2808_v4  ;;  %v837_v14 = vsel %vm833_vm2, 1.0, %v2808_v4 }
 0x4ec   : > { %v902_v9 = vpack.c.b16 %v899_v6, %v898_v5  ;;  %v848_v11 = vmul.f32 %v2810_v7, %v836_v10 }
 0x4ed   : > { %2811 = vrcp.f32 %v841_v8 }
 0x4ee   : > { %1042 = vrot.lane.b32.xlu2 %v902_v9, %s2903_s19  ;;  %v852_v12 = vmul.f32 %v848_v11, %v812_v40  ;;  %v2716_v40 = vld [vmem:[%s3575_s1 + $0xd8] sm:$0xff] }
 0x4f0   : > { %v856_v18 = vpack.c.bf16 %v852_v12, %v852_v12 }
 0x4f2   : > { %v900_v20 = vunpack.c.l.b16 %v856_v18 }
 0x4f3   : > { %v2812_v13 = vpop.eup %2811 }
 0x4f4   : > { %v849_v16 = vmul.f32 %v2812_v13, %v837_v14 }
 0x4f6   : > { %1142 = vperm.xlu2 %2761, %v1104_v15   ;;  %v853_v17 = vmul.f32 %v849_v16, %v813_v53 }
 0x4f8   : > { %v857_v19 = vpack.c.bf16 %v853_v17, %v853_v17 }
 0x4fa   : > { %v901_v21 = vunpack.c.l.b16 %v857_v19 }
 0x4fc   : > { %v903_v22 = vpack.c.b16 %v901_v21, %v900_v20 }
 0x4fe   : > { %906 = vrot.lane.b32.xlu1 %v903_v22, %s2901_s17  ;;  %1044 = vrot.lane.b32.xlu0 %v903_v22, %s2903_s19 }
 0x4ff   : > { %991 = vmatpush.bf16.msrb.mxu1 %v903_v22  ;;  %1117 = vperm.xlu2 %2761, %v1099_v23  }
 0x503   : > { %992 = vmatpush.bf16.msrb.mxu1 %v902_v9 }
 0x506   : > { %1137 = vperm.xlu1 %2762, %v1103_v24   ;;  %904 = vrot.lane.b32.xlu0 %v902_v9, %s2901_s17 }
 0x507   : > { %1112 = vperm.xlu2 %2761, %v1098_v25   ;;  %2516 = vmatmul.msk.bf16.vlgmr.msrb.gmra.mxu1 %vm674_vm14, %v2707_v30 }
 0x50e   : > { %1132 = vperm.xlu1 %2762, %v1102_v26   ;;  %1127 = vperm.xlu0 %2763, %v1101_v27  }
 0x516   : > { %1107 = vperm.xlu1 %2762, %v1097_v28   ;;  %1122 = vperm.xlu0 %2763, %v1100_v29  }
 0x517   : > { %2517 = vmatmul.msk.bf16.gmra.mxu1 %vm674_vm14, %v2708_v31 }
 0x527   : > { %2518 = vmatmul.msk.bf16.gmra.mxu1 %vm674_vm14, %v2709_v32 }
 0x537   : > { %2519 = vmatmul.msk.bf16.gmra.mxu1 %vm674_vm14, %v2710_v39 }
 0x548   : > { %v1043_v35 = vpop.permute.xlu2 %1042 }
 0x550   : > { %v3140_v53 = vpop.permute.xlu2 %1142 }
 0x559   : > { %v1118_v62 = vpop.permute.xlu2 %1117 }
 0x561   : > { %v1113_v16 = vpop.permute.xlu2 %1112 }
 0x570   : > { %v907_v33 = vpop.permute.xlu1 %906  ;;  %v1045_v34 = vpop.permute.xlu0 %1044 }
 0x571   : > { %928 = vmatpush.bf16.msrb.mxu0 %v907_v33  ;;  %1066 = vmatpush.bf16.msra.mxu2 %v1045_v34 }
 0x575   : > { %1067 = vmatpush.bf16.msra.mxu2 %v1043_v35 }
 0x578   : > { %v905_v37 = vpop.permute.xlu0 %904  ;;  %2536 = vmatmul.msk.bf16.vlgmr.msra.gmra.mxu2 %vm674_vm14, %v2715_v36  ;;  %v3138_v51 = vpop.permute.xlu1 %1137 }
 0x579   : > { %929 = vmatpush.bf16.msrb.mxu0 %v905_v37 }
 0x57c   : > { %2496 = vmatmul.msk.bf16.vlgmr.msrb.gmra.mxu0 %vm674_vm14, %v2711_v38 }
 0x580   : > { %v1133_v57 = vpop.permute.xlu1 %1132  ;;  %v1128_v59 = vpop.permute.xlu0 %1127 }
 0x584   : > { %v994_v46 = vpop.f32.mrf.mxu1 }
 0x588   : > { %2537 = vmatmul.msk.bf16.gmra.mxu2 %vm674_vm14, %v2716_v40  ;;  %v1108_v9 = vpop.permute.xlu1 %1107  ;;  %v1123_v13 = vpop.permute.xlu0 %1122 }
 0x58c   : > { %2497 = vmatmul.msk.bf16.gmra.mxu0 %vm674_vm14, %v2712_v41  ;;  %v996_v47 = vpop.f32.mrf.mxu1 }
 0x594   : > { %v999_v50 = vpop.f32.mrf.mxu1 }
 0x598   : > { %2538 = vmatmul.msk.bf16.gmra.mxu2 %vm674_vm14, %v2717_v42 }
 0x59c   : > { %2498 = vmatmul.msk.bf16.gmra.mxu0 %vm674_vm14, %v2713_v43  ;;  %v1001_v56 = vpop.f32.mrf.mxu1 }
 0x5a4   : > { %v1004_v7 = vpop.f32.mrf.mxu1 }
 0x5a8   : > { %2539 = vmatmul.msk.bf16.gmra.mxu2 %vm674_vm14, %v2718_v44 }
 0x5ac   : > { %2499 = vmatmul.msk.bf16.gmra.mxu0 %vm674_vm14, %v2714_v45  ;;  %v1006_v30 = vpop.f32.mrf.mxu1 }
 0x5f9   : > { %v931_v48 = vpop.f32.mrf.mxu0 }
 0x5fa   : > { %v995_v63 = vadd.f32 %v994_v46, %v931_v48 }
 0x5fb   : > { %v1069_v49 = vpop.f32.mrf.mxu2 }
 0x5fc   : > { %v1089_v3 = vadd.f32 %v1069_v49, %v995_v63 }
 0x5fe   : > { %v3145_v14 = vadd.f32 %v1108_v9, %v1089_v3 }
 0x600   : > { %v1153_v19 = vand.u32 2147483647, %v3145_v14  ;;  %vm1185_vm8 = vcmp.ge.f32.partialorder %v3145_v14, 0.0 }
 0x601   : > { %v933_v52 = vpop.f32.mrf.mxu0 }
 0x602   : > { %v997_v1 = vadd.f32 %v996_v47, %v933_v52  ;;  %v1161_v28 = vsub.f32 0.0, %v1153_v19  ;;  %v1009_v47 = vpop.f32.mrf.mxu1 }
 0x603   : > { %v1071_v54 = vpop.f32.mrf.mxu2 }
 0x604   : > { %v1090_v10 = vadd.f32 %v1071_v54, %v997_v1  ;;  %v1169_v34 = vmul.f32 1.442695, %v1161_v28 }
 0x606   : > { %v3147_v17 = vadd.f32 %v1113_v16, %v1090_v10 }
 0x608   : > { %v1154_v25 = vand.u32 2147483647, %v3147_v17  ;;  %vm1186_vm6 = vcmp.ge.f32.partialorder %v3147_v17, 0.0 }
 0x609   : > { %v936_v55 = vpop.f32.mrf.mxu0 }
 0x60a   : > { %v1000_v58 = vadd.f32 %v999_v50, %v936_v55  ;;  %v1162_v32 = vsub.f32 0.0, %v1154_v25  ;;  %v1011_v9 = vpop.f32.mrf.mxu1 }
 0x60b   : > { %v1074_v60 = vpop.f32.mrf.mxu2 }
 0x60c   : > { %v1091_v61 = vadd.f32 %v1074_v60, %v1000_v58  ;;  %v1171_v40 = vmul.f32 1.442695, %v1162_v32 }
 0x60e   : > { %v3142_v0 = vadd.f32 %v1118_v62, %v1091_v61 }
 0x610   : > { %v1155_v2 = vand.u32 2147483647, %v3142_v0  ;;  %vm1187_vm3 = vcmp.ge.f32.partialorder %v3142_v0, 0.0 }
 0x611   : > { %v938_v4 = vpop.f32.mrf.mxu0 }
 0x612   : > { %v1163_v5 = vsub.f32 0.0, %v1155_v2  ;;  %v1002_v6 = vadd.f32 %v1001_v56, %v938_v4 }
 0x613   : > { %v1076_v8 = vpop.f32.mrf.mxu2 }
 0x614   : > { %v1173_v11 = vmul.f32 1.442695, %v1163_v5  ;;  %v1092_v12 = vadd.f32 %v1076_v8, %v1002_v6 }
 0x616   : > { %2813 = vpow2.f32 %v1173_v11  ;;  %v1148_v15 = vadd.f32 %v1123_v13, %v1092_v12 }
 0x618   : > { %v1156_v18 = vand.u32 2147483647, %v1148_v15  ;;  %vm1188_vm4 = vcmp.ge.f32.partialorder %v1148_v15, 0.0 }
 0x619   : > { %v941_v20 = vpop.f32.mrf.mxu0 }
 0x61a   : > { %v1164_v21 = vsub.f32 0.0, %v1156_v18  ;;  %v1005_v22 = vadd.f32 %v1004_v7, %v941_v20 }
 0x61b   : > { %v1079_v23 = vpop.f32.mrf.mxu2 }
 0x61c   : > { %v2814_v24 = vpop.eup %2813  ;;  %v1175_v26 = vmul.f32 1.442695, %v1164_v21  ;;  %v1093_v27 = vadd.f32 %v1079_v23, %v1005_v22 }
 0x61d   : > { %v1203_v29 = vadd.f32 1.0, %v2814_v24  ;;  %v1195_v46 = vsel %vm1187_vm3, 1.0, %v2814_v24 }
 0x61e   : > { %2815 = vpow2.f32 %v1175_v26  ;;  %v3151_v31 = vadd.f32 %v1128_v59, %v1093_v27 }
 0x61f   : > { %2817 = vrcp.f32 %v1203_v29 }
 0x620   : > { %v1157_v33 = vand.u32 2147483647, %v3151_v31  ;;  %2819 = vpow2.f32 %v1169_v34  ;;  %vm1189_vm5 = vcmp.ge.f32.partialorder %v3151_v31, 0.0 }
 0x621   : > { %v943_v35 = vpop.f32.mrf.mxu0 }
 0x622   : > { %v1165_v36 = vsub.f32 0.0, %v1157_v33  ;;  %v1007_v37 = vadd.f32 %v1006_v30, %v943_v35 }
 0x623   : > { %v1081_v38 = vpop.f32.mrf.mxu2 }
 0x624   : > { %v2816_v39 = vpop.eup %2815  ;;  %v1177_v41 = vmul.f32 1.442695, %v1165_v36  ;;  %v1094_v42 = vadd.f32 %v1081_v38, %v1007_v37 }
 0x625   : > { %v2818_v43 = vpop.eup %2817  ;;  %v1204_v44 = vadd.f32 1.0, %v2816_v39  ;;  %v1196_v62 = vsel %vm1188_vm4, 1.0, %v2816_v39 }
 0x626   : > { %2821 = vpow2.f32 %v1177_v41  ;;  %v3155_v45 = vadd.f32 %v1133_v57, %v1094_v42  ;;  %v1219_v49 = vmul.f32 %v2818_v43, %v1195_v46  ;;  %v2820_v55 = vpop.eup %2819 }
 0x627   : > { %2823 = vrcp.f32 %v1204_v44  ;;  %v1201_v4 = vadd.f32 1.0, %v2820_v55  ;;  %v1193_v39 = vsel %vm1185_vm8, 1.0, %v2820_v55 }
 0x628   : > { %2825 = vpow2.f32 %v1171_v40  ;;  %v1158_v48 = vand.u32 2147483647, %v3155_v45  ;;  %v1227_v61 = vmul.f32 %v1219_v49, %v3142_v0  ;;  %vm1190_vm7 = vcmp.ge.f32.partialorder %v3155_v45, 0.0 }
 0x629   : > { %v946_v50 = vpop.f32.mrf.mxu0 }
 0x62a   : > { %v1166_v52 = vsub.f32 0.0, %v1158_v48  ;;  %v1010_v54 = vadd.f32 %v1009_v47, %v946_v50  ;;  %v1235_v7 = vpack.c.bf16 %v1227_v61, %v1227_v61  ;;  %v1511_v61 = vld [vmem:[%s3576_s2 + $0xd0] sm:$0xff] }
 0x62b   : > { %v1084_v56 = vpop.f32.mrf.mxu2 }
 0x62c   : > { %v2822_v58 = vpop.eup %2821  ;;  %v1179_v59 = vmul.f32 1.442695, %v1166_v52  ;;  %v1095_v60 = vadd.f32 %v1084_v56, %v1010_v54 }
 0x62d   : > { %v2824_v57 = vpop.eup %2823  ;;  %v1205_v63 = vadd.f32 1.0, %v2822_v58  ;;  %v1197_v24 = vsel %vm1189_vm5, 1.0, %v2822_v58 }
 0x62e   : > { %v2826_v1 = vpop.eup %2825  ;;  %2827 = vpow2.f32 %v1179_v59  ;;  %v3160_v2 = vadd.f32 %v3138_v51, %v1095_v60  ;;  %v1220_v3 = vmul.f32 %v2824_v57, %v1196_v62  ;;  %v1287_v51 = vunpack.c.l.b16 %v1235_v7  ;;  %v1505_v7 = vld [vmem:[%s3576_s2 + $0xa0] sm:$0xff] }
 0x62f   : > { %2829 = vrcp.f32 %v1205_v63  ;;  %v1202_v8 = vadd.f32 1.0, %v2826_v1  ;;  %v1194_v34 = vsel %vm1186_vm6, 1.0, %v2826_v1 }
 0x630   : > { %v1159_v5 = vand.u32 2147483647, %v3160_v2  ;;  %v1228_v6 = vmul.f32 %v1220_v3, %v1148_v15  ;;  %2831 = vrcp.f32 %v1201_v4  ;;  %vm1191_vm9 = vcmp.ge.f32.partialorder %v3160_v2, 0.0 }
 0x631   : > { %v948_v10 = vpop.f32.mrf.mxu0  ;;  %2833 = vrcp.f32 %v1202_v8  ;;  %v1509_v8 = vld [vmem:[%s3576_s2 + $0xc0] sm:$0xff] }
 0x632   : > { %v1167_v11 = vsub.f32 0.0, %v1159_v5  ;;  %v1012_v0 = vadd.f32 %v1011_v9, %v948_v10  ;;  %v1236_v12 = vpack.c.bf16 %v1228_v6, %v1228_v6  ;;  %v1654_v9 = vld [vmem:[%s3576_s2 + $0xe8] sm:$0xff]  ;;  %v1508_v10 = vld [vmem:[%s3576_s2 + $0xb8] sm:$0xff] }
 0x633   : > { %v1086_v13 = vpop.f32.mrf.mxu2 }
 0x634   : > { %v2828_v16 = vpop.eup %2827  ;;  %v1181_v18 = vmul.f32 1.442695, %v1167_v11  ;;  %v1096_v19 = vadd.f32 %v1086_v13, %v1012_v0  ;;  %v1288_v20 = vunpack.c.l.b16 %v1236_v12  ;;  %v1512_v11 = vld [vmem:[%s3576_s2 + $0xd8] sm:$0xff]  ;;  %v1657_v0 = vld [vmem:[%s3576_s2 + $0x100] sm:$0xff]  ;;  %v1507_v13 = vld [vmem:[%s3576_s2 + $0xb0] sm:$0xff] }
 0x635   : > { %v2830_v21 = vpop.eup %2829  ;;  %v1206_v22 = vadd.f32 1.0, %v2828_v16  ;;  %v1198_v35 = vsel %vm1190_vm7, 1.0, %v2828_v16  ;;  %v1653_v12 = vld [vmem:[%s3576_s2 + $0xe0] sm:$0xff]  ;;  %v1660_v16 = vld [vmem:[%s3576_s2 + $0x118] sm:$0xff] }
 0x636   : > { %2835 = vpow2.f32 %v1181_v18  ;;  %v1152_v15 = vadd.f32 %v3140_v53, %v1096_v19  ;;  %v3165_v23 = vpack.c.b16 %v1288_v20, %v1287_v51  ;;  %v1221_v26 = vmul.f32 %v2830_v21, %v1197_v24  ;;  %v2832_v27 = vpop.eup %2831  ;;  %v1656_v18 = vld [vmem:[%s3576_s2 + $0xf8] sm:$0xff]  ;;  %v1506_v19 = vld [vmem:[%s3576_s2 + $0xa8] sm:$0xff]  ;;  %v1774_v51 = vld [vmem:[%s3576_s2 + $0x140] sm:$0xff] }
 0x637   : > { %2837 = vrcp.f32 %v1206_v22  ;;  %v2834_v29 = vpop.eup %2833  ;;  %v1217_v42 = vmul.f32 %v2832_v27, %v1193_v39  ;;  %v1659_v20 = vld [vmem:[%s3576_s2 + $0x110] sm:$0xff]  ;;  %v1773_v22 = vld [vmem:[%s3576_s2 + $0x138] sm:$0xff]  ;;  %v1775_v27 = vld [vmem:[%s3576_s2 + $0x148] sm:$0xff] }
 0x638   : > { %v1160_v25 = vand.u32 2147483647, %v1152_v15  ;;  %1299 = vrot.lane.b32.xlu2 %v3165_v23, %s2901_s17  ;;  %v1229_v53 = vmul.f32 %v1221_v26, %v3151_v31  ;;  %v1218_v38 = vmul.f32 %v2834_v29, %v1194_v34  ;;  %vm1192_vm10 = vcmp.ge.f32.partialorder %v1152_v15, 0.0  ;;  %v1655_v21 = vld [vmem:[%s3576_s2 + $0xf0] sm:$0xff]  ;;  %v1771_v26 = vld [vmem:[%s3576_s2 + $0x128] sm:$0xff] }
 0x639   : > { %v1225_v48 = vmul.f32 %v1217_v42, %v3145_v14  ;;  %v1772_v24 = vld [vmem:[%s3576_s2 + $0x130] sm:$0xff]  ;;  %v2722_v42 = vld [vmem:[%s3575_s1 + $0x108] sm:$0xff] }
 0x63a   : > { %v1168_v28 = vsub.f32 0.0, %v1160_v25  ;;  %v1237_v41 = vpack.c.bf16 %v1229_v53, %v1229_v53  ;;  %v1226_v44 = vmul.f32 %v1218_v38, %v3147_v17  ;;  %v1776_v25 = vld [vmem:[%s3576_s2 + $0x150] sm:$0xff] }
 0x63b   : > { %v2719_v29 = vld [vmem:[%s3575_s1 + $0xf0] sm:$0xff] }
 0x63c   : > { %v2836_v30 = vpop.eup %2835  ;;  %v1183_v32 = vmul.f32 1.442695, %v1168_v28  ;;  %v1289_v31 = vunpack.c.l.b16 %v1237_v41  ;;  %v1234_v54 = vpack.c.bf16 %v1226_v44, %v1226_v44  ;;  %v1770_v28 = vld [vmem:[%s3576_s2 + $0x120] sm:$0xff]  ;;  %v2723_v38 = vld [vmem:[%s3575_s1 + $0x110] sm:$0xff]  ;;  %v2728_v44 = vld [vmem:[%s3575_s1 + $0x138] sm:$0xff] }
 0x63d   : > { %v2838_v33 = vpop.eup %2837  ;;  %v1207_v36 = vadd.f32 1.0, %v2836_v30  ;;  %v1199_v55 = vsel %vm1191_vm9, 1.0, %v2836_v30  ;;  %v2720_v30 = vld [vmem:[%s3575_s1 + $0xf8] sm:$0xff]  ;;  %v2727_v41 = vld [vmem:[%s3575_s1 + $0x130] sm:$0xff] }
 0x63e   : > { %2839 = vpow2.f32 %v1183_v32  ;;  %v1222_v37 = vmul.f32 %v2838_v33, %v1198_v35  ;;  %v1286_v17 = vunpack.c.l.b16 %v1234_v54 }
 0x63f   : > { %2841 = vrcp.f32 %v1207_v36  ;;  %v2721_v36 = vld [vmem:[%s3575_s1 + $0x100] sm:$0xff] }
 0x640   : > { %v1230_v40 = vmul.f32 %v1222_v37, %v3155_v45  ;;  %v1233_v45 = vpack.c.bf16 %v1225_v48, %v1225_v48  ;;  %v2730_v48 = vld [vmem:[%s3575_s1 + $0x148] sm:$0xff] }
 0x642   : > { %v1238_v43 = vpack.c.bf16 %v1230_v40, %v1230_v40  ;;  %v1285_v58 = vunpack.c.l.b16 %v1233_v45 }
 0x644   : > { %v2840_v46 = vpop.eup %2839  ;;  %v1290_v47 = vunpack.c.l.b16 %v1238_v43  ;;  %v1293_v57 = vpack.c.b16 %v1286_v17, %v1285_v58  ;;  %v2724_v43 = vld [vmem:[%s3575_s1 + $0x118] sm:$0xff] }
 0x645   : > { %v2842_v49 = vpop.eup %2841  ;;  %v1208_v50 = vadd.f32 1.0, %v2840_v46  ;;  %v1200_v60 = vsel %vm1192_vm10, 1.0, %v2840_v46  ;;  %v2725_v46 = vld [vmem:[%s3575_s1 + $0x120] sm:$0xff] }
 0x646   : > { %v1295_v52 = vpack.c.b16 %v1290_v47, %v1289_v31  ;;  %v1223_v56 = vmul.f32 %v2842_v49, %v1199_v55  ;;  %v2729_v31 = vld [vmem:[%s3575_s1 + $0x140] sm:$0xff]  ;;  %v2726_v47 = vld [vmem:[%s3575_s1 + $0x128] sm:$0xff] }
 0x647   : > { %2843 = vrcp.f32 %v1208_v50 }
 0x648   : > { %1301 = vrot.lane.b32.xlu1 %v1295_v52, %s2901_s17  ;;  %1448 = vrot.lane.b32.xlu2 %v1295_v52, %s2903_s19  ;;  %v1231_v59 = vmul.f32 %v1223_v56, %v3160_v2  ;;  %v1510_v2 = vld [vmem:[%s3576_s2 + $0xc8] sm:$0xff] }
 0x64a   : > { %v1239_v1 = vpack.c.bf16 %v1231_v59, %v1231_v59 }
 0x64c   : > { %v1291_v4 = vunpack.c.l.b16 %v1239_v1 }
 0x64d   : > { %v2844_v14 = vpop.eup %2843 }
 0x64e   : > { %v1224_v62 = vmul.f32 %v2844_v14, %v1200_v60 }
 0x650   : > { %1545 = vperm.xlu2 %2761, %v1511_v61   ;;  %1297 = vrot.lane.b32.xlu1 %v1293_v57, %s2901_s17  ;;  %v1232_v63 = vmul.f32 %v1224_v62, %v1152_v15  ;;  %v1777_v15 = vld [vmem:[%s3576_s2 + $0x158] sm:$0xff] }
 0x652   : > { %v1240_v3 = vpack.c.bf16 %v1232_v63, %v1232_v63 }
 0x654   : > { %v1292_v5 = vunpack.c.l.b16 %v1240_v3 }
 0x656   : > { %v1296_v6 = vpack.c.b16 %v1292_v5, %v1291_v4 }
 0x658   : > { %1303 = vrot.lane.b32.xlu0 %v1296_v6, %s2901_s17  ;;  %1391 = vmatpush.bf16.msra.mxu0 %v1296_v6 }
 0x659   : > { %1540 = vperm.xlu2 %2761, %v1510_v2   ;;  %1444 = vrot.lane.b32.xlu1 %v1293_v57, %s2903_s19 }
 0x65c   : > { %1392 = vmatpush.bf16.msra.mxu0 %v1295_v52 }
 0x660   : > { %1450 = vrot.lane.b32.xlu0 %v1296_v6, %s2903_s19  ;;  %1393 = vmatpush.bf16.msra.mxu0 %v3165_v23 }
 0x661   : > { %1515 = vperm.xlu2 %2761, %v1505_v7   ;;  %1535 = vperm.xlu1 %2762, %v1509_v8  }
 0x664   : > { %1394 = vmatpush.bf16.msra.mxu0 %v1293_v57 }
 0x667   : > { %2576 = vmatmul.msk.bf16.vlgmr.msra.gmra.mxu0 %vm1309_vm11, %v2719_v29 }
 0x668   : > { %1446 = vrot.lane.b32.xlu0 %v3165_v23, %s2903_s19  ;;  %v1658_v23 = vld [vmem:[%s3576_s2 + $0x108] sm:$0xff] }
 0x669   : > { %1668 = vperm.xlu2 %2761, %v1654_v9   ;;  %1530 = vperm.xlu1 %2762, %v1508_v10  }
 0x670   : > { %1550 = vperm.xlu0 %2763, %v1512_v11  }
 0x671   : > { %1683 = vperm.xlu2 %2761, %v1657_v0   ;;  %1663 = vperm.xlu1 %2762, %v1653_v12  }
 0x677   : > { %2577 = vmatmul.msk.bf16.gmra.mxu0 %vm1309_vm11, %v2720_v30 }
 0x678   : > { %1525 = vperm.xlu0 %2763, %v1507_v13  }
 0x679   : > { %1698 = vperm.xlu2 %2761, %v1660_v16   ;;  %1678 = vperm.xlu1 %2762, %v1656_v18  }
 0x680   : > { %1520 = vperm.xlu0 %2763, %v1506_v19  }
 0x681   : > { %1800 = vperm.xlu2 %2761, %v1774_v51   ;;  %1693 = vperm.xlu1 %2762, %v1659_v20  }
 0x687   : > { %2578 = vmatmul.msk.bf16.gmra.mxu0 %vm1309_vm11, %v2721_v36 }
 0x688   : > { %1673 = vperm.xlu0 %2763, %v1655_v21  }
 0x689   : > { %1795 = vperm.xlu2 %2761, %v1773_v22   ;;  %1815 = vperm.xlu1 %2762, %v1777_v15  }
 0x690   : > { %1688 = vperm.xlu0 %2763, %v1658_v23  }
 0x691   : > { %1790 = vperm.xlu1 %2762, %v1772_v24  }
 0x692   : > { %v1300_v33 = vpop.permute.xlu2 %1299 }
 0x697   : > { %2579 = vmatmul.msk.bf16.gmra.mxu0 %vm1309_vm11, %v2722_v42 }
 0x698   : > { %1810 = vperm.xlu0 %2763, %v1776_v25  }
 0x699   : > { %1785 = vperm.xlu1 %2762, %v1771_v26  }
 0x6a0   : > { %1805 = vperm.xlu0 %2763, %v1775_v27  }
 0x6a2   : > { %v1449_v37 = vpop.permute.xlu2 %1448 }
 0x6a8   : > { %1780 = vperm.xlu0 %2763, %v1770_v28  }
 0x6aa   : > { %v1546_v4 = vpop.permute.xlu2 %1545 }
 0x6b3   : > { %v1541_v16 = vpop.permute.xlu2 %1540 }
 0x6ba   : > { %v1302_v32 = vpop.permute.xlu1 %1301 }
 0x6c2   : > { %v1298_v35 = vpop.permute.xlu1 %1297 }
 0x6ca   : > { %v1304_v53 = vpop.permute.xlu0 %1303 }
 0x6cb   : > { %1326 = vmatpush.bf16.msra.mxu3 %v1304_v53  ;;  %v1445_v40 = vpop.permute.xlu1 %1444 }
 0x6cf   : > { %1327 = vmatpush.bf16.msra.mxu3 %v1302_v32 }
 0x6d2   : > { %v1451_v34 = vpop.permute.xlu0 %1450 }
 0x6d3   : > { %1328 = vmatpush.bf16.msra.mxu3 %v1300_v33  ;;  %1472 = vmatpush.bf16.msra.mxu1 %v1451_v34  ;;  %v1536_v6 = vpop.permute.xlu1 %1535 }
 0x6d7   : > { %1329 = vmatpush.bf16.msra.mxu3 %v1298_v35  ;;  %1473 = vmatpush.bf16.msra.mxu1 %v1449_v37  ;;  %v1516_v35 = vpop.permute.xlu2 %1515 }
 0x6da   : > { %v1447_v39 = vpop.permute.xlu0 %1446  ;;  %2556 = vmatmul.msk.bf16.vlgmr.msra.gmra.mxu3 %vm1309_vm11, %v2723_v38 }
 0x6db   : > { %1474 = vmatpush.bf16.msra.mxu1 %v1447_v39  ;;  %v1531_v24 = vpop.permute.xlu1 %1530 }
 0x6df   : > { %1475 = vmatpush.bf16.msra.mxu1 %v1445_v40 }
 0x6e2   : > { %2596 = vmatmul.msk.bf16.vlgmr.msra.gmra.mxu1 %vm1309_vm11, %v2727_v41  ;;  %v1551_v1 = vpop.permute.xlu0 %1550 }
 0x6e4   : > { %v1396_v49 = vpop.f32.mrf.mxu0 }
 0x6ea   : > { %2557 = vmatmul.msk.bf16.gmra.mxu3 %vm1309_vm11, %v2724_v43  ;;  %v1526_v10 = vpop.permute.xlu0 %1525 }
 0x6ec   : > { %v1398_v50 = vpop.f32.mrf.mxu0 }
 0x6f2   : > { %2597 = vmatmul.msk.bf16.gmra.mxu1 %vm1309_vm11, %v2728_v44  ;;  %v1521_v53 = vpop.permute.xlu0 %1520 }
 0x6f4   : > { %v1401_v56 = vpop.f32.mrf.mxu0 }
 0x6fa   : > { %2558 = vmatmul.msk.bf16.gmra.mxu3 %vm1309_vm11, %v2725_v46 }
 0x6fc   : > { %v1403_v14 = vpop.f32.mrf.mxu0 }
 0x702   : > { %2598 = vmatmul.msk.bf16.gmra.mxu1 %vm1309_vm11, %v2729_v31 }
 0x704   : > { %v1406_v57 = vpop.f32.mrf.mxu0 }
 0x70a   : > { %2559 = vmatmul.msk.bf16.gmra.mxu3 %vm1309_vm11, %v2726_v47 }
 0x70c   : > { %v1408_v5 = vpop.f32.mrf.mxu0 }
 0x712   : > { %2599 = vmatmul.msk.bf16.gmra.mxu1 %vm1309_vm11, %v2730_v48 }
 0x714   : > { %v1411_v19 = vpop.f32.mrf.mxu0 }
 0x71c   : > { %v1413_v41 = vpop.f32.mrf.mxu0 }
 0x75d   : > { %v1331_v52 = vpop.f32.mrf.mxu3 }
 0x75e   : > { %v1397_v54 = vadd.f32 %v1396_v49, %v1331_v52 }
 0x75f   : > { %v1477_v55 = vpop.f32.mrf.mxu1 }
 0x760   : > { %v1497_v45 = vadd.f32 %v1477_v55, %v1397_v54 }
 0x762   : > { %v3324_v43 = vadd.f32 %v1516_v35, %v1497_v45 }
 0x764   : > { %vm1593_vm4 = vcmp.ge.f32.partialorder %v3324_v43, 0.0 }
 0x765   : > { %v1333_v17 = vpop.f32.mrf.mxu3 }
 0x766   : > { %v1399_v18 = vadd.f32 %v1398_v50, %v1333_v17 }
 0x767   : > { %v1479_v58 = vpop.f32.mrf.mxu1 }
 0x768   : > { %v1498_v25 = vadd.f32 %v1479_v58, %v1399_v18 }
 0x76a   : > { %v3319_v34 = vadd.f32 %v1521_v53, %v1498_v25 }
 0x76c   : > { %v1562_v31 = vand.u32 2147483647, %v3319_v34  ;;  %vm1594_vm3 = vcmp.ge.f32.partialorder %v3319_v34, 0.0 }
 0x76d   : > { %v1336_v59 = vpop.f32.mrf.mxu3 }
 0x76e   : > { %v1402_v12 = vadd.f32 %v1401_v56, %v1336_v59  ;;  %v1561_v56 = vand.u32 2147483647, %v3324_v43  ;;  %v1570_v58 = vsub.f32 0.0, %v1562_v31 }
 0x76f   : > { %v1482_v60 = vpop.f32.mrf.mxu1 }
 0x770   : > { %v1499_v21 = vadd.f32 %v1482_v60, %v1402_v12  ;;  %v1569_v60 = vsub.f32 0.0, %v1561_v56 }
 0x772   : > { %v3314_v30 = vadd.f32 %v1526_v10, %v1499_v21 }
 0x774   : > { %v1563_v39 = vand.u32 2147483647, %v3314_v30  ;;  %vm1595_vm2 = vcmp.ge.f32.partialorder %v3314_v30, 0.0 }
 0x775   : > { %v1338_v61 = vpop.f32.mrf.mxu3 }
 0x776   : > { %v1404_v11 = vadd.f32 %v1403_v14, %v1338_v61  ;;  %v1571_v54 = vsub.f32 0.0, %v1563_v39 }
 0x777   : > { %v1484_v62 = vpop.f32.mrf.mxu1 }
 0x778   : > { %v1500_v51 = vadd.f32 %v1484_v62, %v1404_v11  ;;  %v1581_v14 = vmul.f32 1.442695, %v1571_v54  ;;  %v1579_v62 = vmul.f32 1.442695, %v1570_v58  ;;  %v2735_v58 = vld [vmem:[%s3575_s1 + $0x170] sm:$0xff] }
 0x77a   : > { %v3311_v27 = vadd.f32 %v1531_v24, %v1500_v51 }
 0x77c   : > { %v1564_v36 = vand.u32 2147483647, %v3311_v27  ;;  %vm1596_vm1 = vcmp.ge.f32.partialorder %v3311_v27, 0.0 }
 0x77d   : > { %v1341_v63 = vpop.f32.mrf.mxu3 }
 0x77e   : > { %v1407_v2 = vadd.f32 %v1406_v57, %v1341_v63  ;;  %v1572_v48 = vsub.f32 0.0, %v1564_v36 }
 0x77f   : > { %v1487_v3 = vpop.f32.mrf.mxu1 }
 0x780   : > { %v1501_v13 = vadd.f32 %v1487_v3, %v1407_v2  ;;  %v1583_v59 = vmul.f32 1.442695, %v1572_v48 }
 0x782   : > { %v3309_v22 = vadd.f32 %v1536_v6, %v1501_v13 }
 0x784   : > { %v1565_v32 = vand.u32 2147483647, %v3309_v22  ;;  %vm1597_vm0 = vcmp.ge.f32.partialorder %v3309_v22, 0.0 }
 0x785   : > { %v1343_v7 = vpop.f32.mrf.mxu3 }
 0x786   : > { %v1409_v8 = vadd.f32 %v1408_v5, %v1343_v7  ;;  %v1573_v40 = vsub.f32 0.0, %v1565_v32 }
 0x787   : > { %v1489_v9 = vpop.f32.mrf.mxu1 }
 0x788   : > { %v1502_v0 = vadd.f32 %v1489_v9, %v1409_v8  ;;  %v1585_v55 = vmul.f32 1.442695, %v1573_v40 }
 0x78a   : > { %v3307_v20 = vadd.f32 %v1541_v16, %v1502_v0 }
 0x78c   : > { %v1566_v28 = vand.u32 2147483647, %v3307_v20  ;;  %vm1598_vm13 = vcmp.ge.f32.partialorder %v3307_v20, 0.0 }
 0x78d   : > { %v1346_v15 = vpop.f32.mrf.mxu3 }
 0x78e   : > { %v1412_v23 = vadd.f32 %v1411_v19, %v1346_v15  ;;  %v1574_v37 = vsub.f32 0.0, %v1566_v28 }
 0x78f   : > { %v1492_v26 = vpop.f32.mrf.mxu1 }
 0x790   : > { %v1503_v29 = vadd.f32 %v1492_v26, %v1412_v23  ;;  %v1587_v49 = vmul.f32 1.442695, %v1574_v37 }
 0x792   : > { %v3317_v33 = vadd.f32 %v1546_v4, %v1503_v29  ;;  %v1577_v4 = vmul.f32 1.442695, %v1569_v60  ;;  %v2738_v60 = vld [vmem:[%s3575_s1 + $0x188] sm:$0xff] }
 0x794   : > { %v1567_v38 = vand.u32 2147483647, %v3317_v33  ;;  %vm1599_vm12 = vcmp.ge.f32.partialorder %v3317_v33, 0.0 }
 0x795   : > { %v1348_v42 = vpop.f32.mrf.mxu3 }
 0x796   : > { %v1575_v44 = vsub.f32 0.0, %v1567_v38  ;;  %v1414_v46 = vadd.f32 %v1413_v41, %v1348_v42 }
 0x797   : > { %v1494_v47 = vpop.f32.mrf.mxu1 }
 0x798   : > { %v1589_v50 = vmul.f32 1.442695, %v1575_v44  ;;  %v1504_v52 = vadd.f32 %v1494_v47, %v1414_v46 }
 0x79a   : > { %2845 = vpow2.f32 %v1589_v50  ;;  %v1560_v17 = vadd.f32 %v1551_v1, %v1504_v52 }
 0x79b   : > { %2847 = vpow2.f32 %v1587_v49 }
 0x79c   : > { %v1568_v45 = vand.u32 2147483647, %v1560_v17  ;;  %2849 = vpow2.f32 %v1585_v55  ;;  %vm1600_vm15 = vcmp.ge.f32.partialorder %v1560_v17, 0.0 }
 0x79d   : > { %2851 = vpow2.f32 %v1583_v59  ;;  %v2733_v59 = vld [vmem:[%s3575_s1 + $0x160] sm:$0xff] }
 0x79e   : > { %v1576_v61 = vsub.f32 0.0, %v1568_v45  ;;  %2853 = vpow2.f32 %v1581_v14  ;;  %v2737_v45 = vld [vmem:[%s3575_s1 + $0x180] sm:$0xff]  ;;  %v2734_v14 = vld [vmem:[%s3575_s1 + $0x168] sm:$0xff] }
 0x7a0   : > { %v2846_v57 = vpop.eup %2845  ;;  %v1591_v63 = vmul.f32 1.442695, %v1576_v61 }
 0x7a1   : > { %v2848_v3 = vpop.eup %2847  ;;  %v1615_v6 = vadd.f32 1.0, %v2846_v57  ;;  %v1607_v51 = vsel %vm1599_vm12, 1.0, %v2846_v57 }
 0x7a2   : > { %2855 = vpow2.f32 %v1591_v63  ;;  %v2850_v5 = vpop.eup %2849  ;;  %v1614_v1 = vadd.f32 1.0, %v2848_v3  ;;  %v1606_v25 = vsel %vm1598_vm13, 1.0, %v2848_v3  ;;  %v1664_v63 = vpop.permute.xlu1 %1663 }
 0x7a3   : > { %2857 = vpow2.f32 %v1579_v62  ;;  %v2852_v2 = vpop.eup %2851  ;;  %v1613_v7 = vadd.f32 1.0, %v2850_v5  ;;  %v1605_v53 = vsel %vm1597_vm0, 1.0, %v2850_v5  ;;  %v1669_v62 = vpop.permute.xlu2 %1668 }
 0x7a4   : > { %2859 = vpow2.f32 %v1577_v4  ;;  %v2854_v8 = vpop.eup %2853  ;;  %v1612_v11 = vadd.f32 1.0, %v2852_v2  ;;  %v1604_v39 = vsel %vm1596_vm1, 1.0, %v2852_v2 }
 0x7a5   : > { %2861 = vrcp.f32 %v1615_v6  ;;  %v1611_v12 = vadd.f32 1.0, %v2854_v8  ;;  %v1603_v46 = vsel %vm1595_vm2, 1.0, %v2854_v8 }
 0x7a6   : > { %2863 = vrcp.f32 %v1614_v1 }
 0x7a7   : > { %2865 = vrcp.f32 %v1613_v7 }
 0x7a8   : > { %v2856_v9 = vpop.eup %2855 }
 0x7a9   : > { %v1616_v10 = vadd.f32 1.0, %v2856_v9  ;;  %v2858_v0 = vpop.eup %2857  ;;  %v1608_v26 = vsel %vm1600_vm15, 1.0, %v2856_v9  ;;  %v1674_v9 = vpop.permute.xlu0 %1673 }
 0x7aa   : > { %v2860_v13 = vpop.eup %2859  ;;  %v1610_v18 = vadd.f32 1.0, %v2858_v0  ;;  %v1602_v48 = vsel %vm1594_vm3, 1.0, %v2858_v0  ;;  %v1679_v8 = vpop.permute.xlu1 %1678 }
 0x7ab   : > { %2867 = vrcp.f32 %v1616_v10  ;;  %v2862_v16 = vpop.eup %2861  ;;  %v1609_v21 = vadd.f32 1.0, %v2860_v13  ;;  %v1601_v52 = vsel %vm1593_vm4, 1.0, %v2860_v13 }
 0x7ac   : > { %2869 = vrcp.f32 %v1612_v11  ;;  %v2864_v19 = vpop.eup %2863  ;;  %v1631_v23 = vmul.f32 %v2862_v16, %v1607_v51  ;;  %v1684_v16 = vpop.permute.xlu2 %1683 }
 0x7ad   : > { %2871 = vrcp.f32 %v1611_v12  ;;  %v2866_v15 = vpop.eup %2865  ;;  %v1630_v29 = vmul.f32 %v2864_v19, %v1606_v25 }
 0x7ae   : > { %2873 = vrcp.f32 %v1610_v18  ;;  %v3333_v35 = vmul.f32 %v1631_v23, %v3317_v33  ;;  %v1629_v37 = vmul.f32 %v2866_v15, %v1605_v53 }
 0x7af   : > { %2875 = vrcp.f32 %v1609_v21  ;;  %v3341_v41 = vmul.f32 %v1630_v29, %v3307_v20 }
 0x7b0   : > { %v3345_v33 = vmul.f32 %v1629_v37, %v3309_v22 }
 0x7b1   : > { %v2868_v24 = vpop.eup %2867  ;;  %v1689_v21 = vpop.permute.xlu0 %1688 }
 0x7b2   : > { %v1632_v28 = vmul.f32 %v2868_v24, %v1608_v26  ;;  %v2870_v32 = vpop.eup %2869  ;;  %v1643_v20 = vpack.c.bf16 %v3341_v41, %v3345_v33  ;;  %v1694_v51 = vpop.permute.xlu1 %1693  ;;  %v2739_v26 = vld [vmem:[%s3575_s1 + $0x190] sm:$0xff] }
 0x7b3   : > { %v2872_v38 = vpop.eup %2871  ;;  %v1628_v42 = vmul.f32 %v2870_v32, %v1604_v39 }
 0x7b4   : > { %v3335_v36 = vmul.f32 %v1632_v28, %v1560_v17  ;;  %v2874_v44 = vpop.eup %2873  ;;  %v1627_v31 = vmul.f32 %v2872_v38, %v1603_v46  ;;  %v1699_v28 = vpop.permute.xlu2 %1698 }
 0x7b5   : > { %v2876_v47 = vpop.eup %2875  ;;  %v3351_v49 = vmul.f32 %v1628_v42, %v3311_v27  ;;  %v1626_v50 = vmul.f32 %v2874_v44, %v1602_v48  ;;  %v2740_v42 = vld [vmem:[%s3575_s1 + $0x198] sm:$0xff] }
 0x7b6   : > { %v1644_v40 = vpack.c.bf16 %v3335_v36, %v3333_v35  ;;  %v3354_v54 = vmul.f32 %v1627_v31, %v3314_v30  ;;  %v1625_v22 = vmul.f32 %v2876_v47, %v1601_v52  ;;  %v2731_v30 = vld [vmem:[%s3575_s1 + $0x150] sm:$0xff] }
 0x7b7   : > { %v3359_v56 = vmul.f32 %v1626_v50, %v3319_v34  ;;  %v2732_v34 = vld [vmem:[%s3575_s1 + $0x158] sm:$0xff] }
 0x7b8   : > { %1737 = vmatpush.bf16.msrb.mxu2 %v1644_v40  ;;  %1854 = vmatpush.bf16.msrb.mxu3 %v1644_v40  ;;  %v1642_v55 = vpack.c.bf16 %v3351_v49, %v3354_v54  ;;  %v3362_v27 = vmul.f32 %v1625_v22, %v3324_v43  ;;  %v2736_v43 = vld [vmem:[%s3575_s1 + $0x178] sm:$0xff] }
 0x7b9   : > { %1971 = vmatpush.bf16.msrb.mxu0 %v1644_v40  ;;  %v1811_v53 = vpop.permute.xlu0 %1810 }
 0x7ba   : > { %v1641_v17 = vpack.c.bf16 %v3359_v56, %v3362_v27  ;;  %v1816_v32 = vpop.permute.xlu1 %1815 }
 0x7bc   : > { %1738 = vmatpush.bf16.msrb.mxu2 %v1643_v20  ;;  %1855 = vmatpush.bf16.msrb.mxu3 %v1643_v20  ;;  %v1801_v39 = vpop.permute.xlu2 %1800 }
 0x7bd   : > { %1972 = vmatpush.bf16.msrb.mxu0 %v1643_v20 }
 0x7c0   : > { %1739 = vmatpush.bf16.msrb.mxu2 %v1642_v55  ;;  %1856 = vmatpush.bf16.msrb.mxu3 %v1642_v55 }
 0x7c1   : > { %1973 = vmatpush.bf16.msrb.mxu0 %v1642_v55  ;;  %v1806_v50 = vpop.permute.xlu0 %1805 }
 0x7c2   : > { %v1791_v40 = vpop.permute.xlu1 %1790 }
 0x7c4   : > { %1740 = vmatpush.bf16.msrb.mxu2 %v1641_v17  ;;  %1857 = vmatpush.bf16.msrb.mxu3 %v1641_v17 }
 0x7c5   : > { %1974 = vmatpush.bf16.msrb.mxu0 %v1641_v17 }
 0x7c7   : > { %2616 = vmatmul.msk.bf16.vlgmr.msrb.gmra.mxu2 %vm1309_vm11, %v2731_v30  ;;  %2636 = vmatmul.msk.bf16.vlgmr.msrb.gmra.mxu3 %vm1309_vm11, %v2735_v58  ;;  %v1796_v30 = vpop.permute.xlu2 %1795 }
 0x7c8   : > { %2656 = vmatmul.msk.bf16.vlgmr.msrb.gmra.mxu0 %vm1309_vm11, %v2739_v26 }
 0x7d7   : > { %2617 = vmatmul.msk.bf16.gmra.mxu2 %vm1309_vm11, %v2732_v34  ;;  %2637 = vmatmul.msk.bf16.gmra.mxu3 %vm1309_vm11, %v2736_v43 }
 0x7d8   : > { %2657 = vmatmul.msk.bf16.gmra.mxu0 %vm1309_vm11, %v2740_v42  ;;  %v1890_v42 = vld [vmem:[%s3576_s2 + $0x178] sm:$0xff] }
 0x7e7   : > { %2618 = vmatmul.msk.bf16.gmra.mxu2 %vm1309_vm11, %v2733_v59  ;;  %2638 = vmatmul.msk.bf16.gmra.mxu3 %vm1309_vm11, %v2737_v45  ;;  %v1786_v59 = vpop.permute.xlu1 %1785 }
 0x7f7   : > { %2619 = vmatmul.msk.bf16.gmra.mxu2 %vm1309_vm11, %v2734_v14  ;;  %2639 = vmatmul.msk.bf16.gmra.mxu3 %vm1309_vm11, %v2738_v60  ;;  %v1781_v60 = vpop.permute.xlu0 %1780 }
 0x84a   : > { %v1742_v61 = vpop.f32.mrf.mxu2  ;;  %v3398_v57 = vpop.f32.mrf.mxu3 }
 0x84b   : > { %v1743_v5 = vadd.f32 %v1742_v61, %v1664_v63  ;;  %v1860_v61 = vadd.f32 %v3398_v57, %v1781_v60  ;;  %v1889_v63 = vld [vmem:[%s3576_s2 + $0x170] sm:$0xff] }
 0x852   : > { %v1744_v3 = vpop.f32.mrf.mxu2  ;;  %v1861_v4 = vpop.f32.mrf.mxu3 }
 0x853   : > { %v1745_v6 = vadd.f32 %v1744_v3, %v1669_v62  ;;  %v1862_v45 = vadd.f32 %v1861_v4, %v1786_v59 }
 0x855   : > { %v1996_v1 = vpack.c.bf16 %v1745_v6, %v1743_v5  ;;  %v2000_v62 = vpack.c.bf16 %v1862_v45, %v1860_v61 }
 0x857   : > { %2004 = vxpose.xlu2.c.b16.start [1/4] (short) (narrow) %v1996_v1, 32 }
 0x85a   : > { %v1747_v2 = vpop.f32.mrf.mxu2  ;;  %v1864_v7 = vpop.f32.mrf.mxu3 }
 0x85b   : > { %v1748_v0 = vadd.f32 %v1747_v2, %v1674_v9  ;;  %v1865_v43 = vadd.f32 %v1864_v7, %v1791_v40  ;;  %v1887_v40 = vld [vmem:[%s3576_s2 + $0x160] sm:$0xff] }
 0x862   : > { %v1749_v10 = vpop.f32.mrf.mxu2  ;;  %v1866_v11 = vpop.f32.mrf.mxu3 }
 0x863   : > { %v1750_v12 = vadd.f32 %v1749_v10, %v1679_v8  ;;  %v1867_v58 = vadd.f32 %v1866_v11, %v1796_v30  ;;  %v2741_v11 = vld [vmem:[%s3575_s1 + $0x1a0] sm:$0xff]  ;;  %v2213_v30 = vld [vmem:[%s3576_s2 + $0x1d8] sm:$0xff] }
 0x864   : > { %2658 = vmatmul.msk.bf16.gmra.mxu0 %vm1309_vm11, %v2741_v11 }
 0x865   : > { %v1997_v13 = vpack.c.bf16 %v1750_v12, %v1748_v0  ;;  %v2001_v14 = vpack.c.bf16 %v1867_v58, %v1865_v43  ;;  %v2212_v58 = vld [vmem:[%s3576_s2 + $0x1d0] sm:$0xff] }
 0x867   : > { %2005 = vxpose.xlu2.c.b16.cont [2/4] (short) (narrow) %v1997_v13, 32 }
 0x86a   : > { %v1752_v18 = vpop.f32.mrf.mxu2  ;;  %v1869_v19 = vpop.f32.mrf.mxu3 }
 0x86b   : > { %v1753_v24 = vadd.f32 %v1752_v18, %v1684_v16  ;;  %v1870_v17 = vadd.f32 %v1869_v19, %v1801_v39 }
 0x872   : > { %v1754_v15 = vpop.f32.mrf.mxu2  ;;  %v1871_v23 = vpop.f32.mrf.mxu3 }
 0x873   : > { %v1755_v25 = vadd.f32 %v1754_v15, %v1689_v21  ;;  %v1872_v52 = vadd.f32 %v1871_v23, %v1806_v50  ;;  %v2206_v50 = vld [vmem:[%s3576_s2 + $0x1a0] sm:$0xff] }
 0x875   : > { %v1998_v29 = vpack.c.bf16 %v1755_v25, %v1753_v24  ;;  %v2002_v34 = vpack.c.bf16 %v1872_v52, %v1870_v17  ;;  %v2742_v25 = vld [vmem:[%s3575_s1 + $0x1a8] sm:$0xff]  ;;  %v2209_v52 = vld [vmem:[%s3576_s2 + $0x1b8] sm:$0xff]  ;;  %v2210_v17 = vld [vmem:[%s3576_s2 + $0x1c0] sm:$0xff] }
 0x876   : > { %2659 = vmatmul.msk.bf16.gmra.mxu0 %vm1309_vm11, %v2742_v25 }
 0x877   : > { %2006 = vxpose.xlu2.c.b16.cont [3/4] (short) (narrow) %v1998_v29, 32 }
 0x87a   : > { %v1757_v37 = vpop.f32.mrf.mxu2  ;;  %v1874_v38 = vpop.f32.mrf.mxu3 }
 0x87b   : > { %v1758_v31 = vadd.f32 %v1757_v37, %v1694_v51  ;;  %v1875_v47 = vadd.f32 %v1874_v38, %v1811_v53 }
 0x882   : > { %v1759_v44 = vpop.f32.mrf.mxu2  ;;  %v1876_v46 = vpop.f32.mrf.mxu3 }
 0x883   : > { %v1760_v48 = vadd.f32 %v1759_v44, %v1699_v28  ;;  %v1877_v20 = vadd.f32 %v1876_v46, %v1816_v32  ;;  %v1888_v44 = vld [vmem:[%s3576_s2 + $0x168] sm:$0xff] }
 0x884   : > { %v1892_v46 = vld [vmem:[%s3576_s2 + $0x188] sm:$0xff] }
 0x885   : > { %v1999_v22 = vpack.c.bf16 %v1760_v48, %v1758_v31  ;;  %v2003_v55 = vpack.c.bf16 %v1877_v20, %v1875_v47  ;;  %v1891_v31 = vld [vmem:[%s3576_s2 + $0x180] sm:$0xff]  ;;  %v1894_v47 = vld [vmem:[%s3576_s2 + $0x198] sm:$0xff]  ;;  %v1893_v48 = vld [vmem:[%s3576_s2 + $0x190] sm:$0xff] }
 0x886   : > { %v2207_v20 = vld [vmem:[%s3576_s2 + $0x1a8] sm:$0xff] }
 0x887   : > { %2030 = vmatpush.bf16.msrb.mxu1 %v2003_v55  ;;  %2007 = vxpose.xlu2.c.b16.end [4/4] (short) (narrow) %v1999_v22, 32  ;;  %v2208_v22 = vld [vmem:[%s3576_s2 + $0x1b0] sm:$0xff]  ;;  %v2211_v55 = vld [vmem:[%s3576_s2 + $0x1c8] sm:$0xff] }
 0x88b   : > { %2031 = vmatpush.bf16.msrb.mxu1 %v2002_v34 }
 0x88f   : > { %2032 = vmatpush.bf16.msrb.mxu1 %v2001_v14 }
 0x893   : > { %2033 = vmatpush.bf16.msrb.mxu1 %v2000_v62 }
 0x8f0   : > { %1907 = vperm.xlu2 %2761, %v1889_v63  }
 0x8f8   : > { %v2012_v3 = vpop.trf.xlu2 }
 0x8f9   : > { %2660 = vmatmul.msk.bf16.vlgmr.msrb.gmra.mxu1 %vm1309_vm11, %v2012_v3 }
 0x908   : > { %v2013_v5 = vpop.trf.xlu2 }
 0x909   : > { %2661 = vmatmul.msk.bf16.gmra.mxu1 %vm1309_vm11, %v2013_v5 }
 0x976   : > { %v2035_v6 = vpop.f32.mrf.mxu1 }
 0x977   : > { %v2045_v7 = vsel %vm674_vm14, %v2035_v6, -inf }
 0x97e   : > { %v2037_v4 = vpop.f32.mrf.mxu1 }
 0x97f   : > { %v2048_v9 = vsel %vm674_vm14, %v2037_v4, -inf }
 0x986   : > { %v2040_v1 = vpop.f32.mrf.mxu1 }
 0x987   : > { %v2051_v2 = vsel %vm674_vm14, %v2040_v1, -inf }
 0x988   : > { %2052 = vmax.xlane.f32.xlu0 %v2051_v2 }
 0x98e   : > { %v2042_v57 = vpop.f32.mrf.mxu1 }
 0x98f   : > { %v2054_v8 = vsel %vm674_vm14, %v2042_v57, -inf }
 0x990   : > { %2046 = vmax.xlane.f32.xlu0 %v2045_v7  ;;  %2055 = vmax.xlane.f32.xlu1 %v2054_v8 }
 0x998   : > { %2049 = vmax.xlane.f32.xlu1 %v2048_v9 }
 0x9fb   : > { %v2053_v10 = vpop.xlane.xlu0 %2052 }
 0x9fc   : > { %v2059_v16 = vsub.f32 %v2040_v1, %v2053_v10 }
 0x9fe   : > { %v2065_v19 = vmul.f32 1.442695, %v2059_v16 }
 0xa03   : > { %v2047_v0 = vpop.xlane.xlu0 %2046  ;;  %v2056_v12 = vpop.xlane.xlu1 %2055 }
 0xa04   : > { %v2057_v13 = vsub.f32 %v2035_v6, %v2047_v0  ;;  %v2060_v23 = vsub.f32 %v2042_v57, %v2056_v12  ;;  %v1976_v12 = vpop.f32.mrf.mxu0 }
 0xa06   : > { %v2061_v18 = vmul.f32 1.442695, %v2057_v13  ;;  %v2067_v28 = vmul.f32 1.442695, %v2060_v23 }
 0xa08   : > { %2877 = vpow2.f32 %v2061_v18 }
 0xa09   : > { %2879 = vpow2.f32 %v2065_v19 }
 0xa0b   : > { %v2050_v51 = vpop.xlane.xlu1 %2049 }
 0xa0c   : > { %v2058_v21 = vsub.f32 %v2037_v4, %v2050_v51 }
 0xa0e   : > { %v3422_v15 = vpop.eup %2877  ;;  %v2063_v24 = vmul.f32 1.442695, %v2058_v21 }
 0xa0f   : > { %v2069_v26 = vsel %vm674_vm14, %v3422_v15, 0.0  ;;  %v3430_v29 = vpop.eup %2879 }
 0xa10   : > { %2881 = vpow2.f32 %v2063_v24  ;;  %2070 = vadd.xlane.f32.xlu0 %v2069_v26  ;;  %v2075_v53 = vsel %vm674_vm14, %v3430_v29, 0.0 }
 0xa11   : > { %2883 = vpow2.f32 %v2067_v28 }
 0xa16   : > { %v3432_v32 = vpop.eup %2881 }
 0xa17   : > { %v2072_v37 = vsel %vm674_vm14, %v3432_v32, 0.0  ;;  %v3438_v38 = vpop.eup %2883 }
 0xa18   : > { %2076 = vadd.xlane.f32.xlu0 %v2075_v53  ;;  %2073 = vadd.xlane.f32.xlu1 %v2072_v37  ;;  %v2078_v39 = vsel %vm674_vm14, %v3438_v38, 0.0 }
 0xa20   : > { %2079 = vadd.xlane.f32.xlu1 %v2078_v39 }
 0xa2c   : > { %1897 = vperm.xlu0 %2763, %v1887_v40  }
 0xa34   : > { %1912 = vperm.xlu0 %2763, %v1890_v42  }
 0xa39   : > { %1902 = vperm.xlu1 %2762, %v1888_v44  }
 0xa3c   : > { %1922 = vperm.xlu0 %2763, %v1892_v46  }
 0xa41   : > { %1917 = vperm.xlu1 %2762, %v1891_v31  }
 0xa44   : > { %1932 = vperm.xlu0 %2763, %v1894_v47  }
 0xa49   : > { %1927 = vperm.xlu1 %2762, %v1893_v48  }
 0xa4c   : > { %2221 = vperm.xlu0 %2763, %v2207_v20  }
 0xa51   : > { %2216 = vperm.xlu1 %2762, %v2206_v50  }
 0xa54   : > { %2231 = vperm.xlu0 %2763, %v2209_v52  }
 0xa59   : > { %2226 = vperm.xlu1 %2762, %v2208_v22  }
 0xa5c   : > { %2241 = vperm.xlu0 %2763, %v2211_v55  }
 0xa61   : > { %2236 = vperm.xlu1 %2762, %v2210_v17   ;;  %v1978_v17 = vpop.f32.mrf.mxu0 }
 0xa64   : > { %2251 = vperm.xlu0 %2763, %v2213_v30  }
 0xa69   : > { %2246 = vperm.xlu1 %2762, %v2212_v58  }
 0xa83   : > { %v3487_v34 = vpop.xlane.xlu0 %2070 }
 0xa84   : > { %2885 = vrcp.f32 %v3487_v34  ;;  %vm2086_vm1 = vweird.f32 %v3487_v34  ;;  %v2092_v37 = vand.u32 2147483648, %v3487_v34  ;;  %v2090_v42 = vand.u32 2147483647, %v3487_v34 }
 0xa86   : > { %v2093_v52 = vor.u32 1.1754944e-38, %v2092_v37 }
 0xa8a   : > { %v3490_v45 = vpop.eup %2885 }
 0xa8b   : > { %v2077_v43 = vpop.xlane.xlu0 %2076  ;;  %v2074_v59 = vpop.xlane.xlu1 %2073  ;;  %v2082_v3 = vmul.f32 %v3490_v45, %v3487_v34  ;;  %vm2087_vm7 = vweird.f32 %v3490_v45 }
 0xa8c   : > { %2887 = vrcp.f32 %v2077_v43  ;;  %v2122_v9 = vand.u32 2147483648, %v2077_v43  ;;  %vm2116_vm6 = vweird.f32 %v2077_v43  ;;  %v2120_v11 = vand.u32 2147483647, %v2077_v43  ;;  %vm2088_vm4 = vmor %vm2086_vm1, %vm2087_vm7 }
 0xa8d   : > { %2889 = vrcp.f32 %v2074_v59  ;;  %v2083_v1 = vsub.f32 1.0, %v2082_v3  ;;  %vm2101_vm12 = vweird.f32 %v2074_v59  ;;  %v2105_v24 = vand.u32 2147483647, %v2074_v59 }
 0xa8e   : > { %v2123_v23 = vor.u32 1.1754944e-38, %v2122_v9  ;;  %v2107_v25 = vand.u32 2147483648, %v2074_v59  ;;  %vm2121_vm13 = vcmp.eq.f32.partialorder %v2120_v11, 8.507059e+37 }
 0xa8f   : > { %v2084_v10 = vmul.f32 %v3490_v45, %v2083_v1 }
 0xa90   : > { %v2108_v31 = vor.u32 1.1754944e-38, %v2107_v25 }
 0xa91   : > { %v2085_v26 = vadd.f32 %v3490_v45, %v2084_v10 }
 0xa92   : > { %v2888_v14 = vpop.eup %2887 }
 0xa93   : > { %v2890_v60 = vpop.eup %2889  ;;  %v2112_v61 = vmul.f32 %v2888_v14, %v2077_v43  ;;  %v2080_v62 = vpop.xlane.xlu1 %2079  ;;  %vm2117_vm5 = vweird.f32 %v2888_v14  ;;  %v2089_v50 = vsel %vm2088_vm4, %v3490_v45, %v2085_v26 }
 0xa94   : > { %v2097_v63 = vmul.f32 %v2890_v60, %v2074_v59  ;;  %2891 = vrcp.f32 %v2080_v62  ;;  %vm3496_vm8 = vmor %vm2116_vm6, %vm2117_vm5  ;;  %vm2102_vm9 = vweird.f32 %v2890_v60  ;;  %v2135_v16 = vand.u32 2147483647, %v2080_v62 }
 0xa95   : > { %v2113_v5 = vsub.f32 1.0, %v2112_v61  ;;  %v2137_v18 = vand.u32 2147483648, %v2080_v62  ;;  %vm3503_vm15 = vmor %vm2101_vm12, %vm2102_vm9  ;;  %vm2131_vm0 = vweird.f32 %v2080_v62  ;;  %vm2106_vm5 = vcmp.eq.f32.partialorder %v2105_v24, 8.507059e+37 }
 0xa96   : > { %v2098_v4 = vsub.f32 1.0, %v2097_v63  ;;  %vm2136_vm3 = vcmp.eq.f32.partialorder %v2135_v16, 8.507059e+37  ;;  %vm2091_vm6 = vcmp.eq.f32.partialorder %v2090_v42, 8.507059e+37  ;;  %v2743_v42 = vld [vmem:[%s3575_s1 + $0x1b0] sm:$0xff] }
 0xa97   : > { %v2114_v6 = vmul.f32 %v2888_v14, %v2113_v5  ;;  %v2138_v39 = vor.u32 1.1754944e-38, %v2137_v18  ;;  %v2094_v30 = vsel %vm2091_vm6, %v2093_v52, %v2089_v50  ;;  %v1908_v5 = vpop.permute.xlu2 %1907 }
 0xa98   : > { %v2099_v7 = vmul.f32 %v2890_v60, %v2098_v4  ;;  %v2095_v43 = vmul.f32 %v3422_v15, %v2094_v30 }
 0xa99   : > { %v2115_v57 = vadd.f32 %v2888_v14, %v2114_v6 }
 0xa9a   : > { %v2892_v2 = vpop.eup %2891  ;;  %v2100_v19 = vadd.f32 %v2890_v60, %v2099_v7 }
 0xa9b   : > { %v2127_v8 = vmul.f32 %v2892_v2, %v2080_v62  ;;  %vm2132_vm10 = vweird.f32 %v2892_v2  ;;  %v2119_v21 = vsel %vm3496_vm8, %v2888_v14, %v2115_v57  ;;  %v1981_v14 = vpop.f32.mrf.mxu0 }
 0xa9c   : > { %vm2133_vm2 = vmor %vm2131_vm0, %vm2132_vm10  ;;  %v2124_v40 = vsel %vm2121_vm13, %v2123_v23, %v2119_v21  ;;  %v2104_v46 = vsel %vm3503_vm15, %v2890_v60, %v2100_v19  ;;  %v1982_v4 = vadd.f32 %v1981_v14, %v1908_v5 }
 0xa9d   : > { %v2128_v0 = vsub.f32 1.0, %v2127_v8  ;;  %v2125_v48 = vmul.f32 %v3430_v29, %v2124_v40  ;;  %v2109_v22 = vsel %vm2106_vm5, %v2108_v31, %v2104_v46  ;;  %v2745_v46 = vld [vmem:[%s3575_s1 + $0x1c0] sm:$0xff]  ;;  %v2746_v31 = vld [vmem:[%s3575_s1 + $0x1c8] sm:$0xff] }
 0xa9e   : > { %v2110_v34 = vmul.f32 %v3432_v32, %v2109_v22  ;;  %v1898_v45 = vpop.permute.xlu0 %1897 }
 0xa9f   : > { %v2129_v51 = vmul.f32 %v2892_v2, %v2128_v0  ;;  %v1977_v61 = vadd.f32 %v1976_v12, %v1898_v45 }
 0xaa0   : > { %v2145_v59 = vpack.c.bf16 %v2110_v34, %v2095_v43 }
 0xaa1   : > { %v2130_v53 = vadd.f32 %v2892_v2, %v2129_v51 }
 0xaa3   : > { %v2134_v44 = vsel %vm2133_vm2, %v2892_v2, %v2130_v53  ;;  %v1983_v63 = vpop.f32.mrf.mxu0 }
 0xaa4   : > { %v2139_v47 = vsel %vm2136_vm3, %v2138_v39, %v2134_v44  ;;  %v2744_v44 = vld [vmem:[%s3575_s1 + $0x1b8] sm:$0xff] }
 0xaa5   : > { %v2140_v20 = vmul.f32 %v3438_v38, %v2139_v47  ;;  %v2160_v38 = vsel %vm674_vm14, %v2145_v59, 0 }
 0xaa6   : > { %v1913_v3 = vpop.permute.xlu0 %1912 }
 0xaa7   : > { %v2146_v55 = vpack.c.bf16 %v2140_v20, %v2125_v48  ;;  %v1984_v6 = vadd.f32 %v1983_v63, %v1913_v3 }
 0xaa9   : > { %v2163_v58 = vsel %vm674_vm14, %v2146_v55, 0  ;;  %v2142_v1 = vpack.c.bf16 %v1984_v6, %v1982_v4 }
 0xaaa   : > { %2171 = vmatpush.bf16.xpose.msra.mxu2 %v2163_v58 }
 0xaab   : > { %v1903_v29 = vpop.permute.xlu1 %1902  ;;  %v1986_v32 = vpop.f32.mrf.mxu0 }
 0xaac   : > { %v1979_v60 = vadd.f32 %v1978_v17, %v1903_v29 }
 0xaae   : > { %v2141_v62 = vpack.c.bf16 %v1979_v60, %v1977_v61  ;;  %v1923_v57 = vpop.permute.xlu0 %1922 }
 0xab2   : > { %2172 = vmatpush.bf16.xpose.msra.mxu2 %v2160_v38 }
 0xab3   : > { %v1988_v15 = vpop.f32.mrf.mxu0  ;;  %v1918_v2 = vpop.permute.xlu1 %1917 }
 0xab4   : > { %v1987_v7 = vadd.f32 %v1986_v32, %v1918_v2  ;;  %v1989_v8 = vadd.f32 %v1988_v15, %v1923_v57 }
 0xab6   : > { %v2143_v9 = vpack.c.bf16 %v1989_v8, %v1987_v7  ;;  %v1933_v12 = vpop.permute.xlu0 %1932 }
 0xab9   : > { %2662 = vmatmul.msk.bf16.vlgmr.msra.gmra.mxu2 %vm674_vm14, %v2141_v62 }
 0xabb   : > { %v1991_v10 = vpop.f32.mrf.mxu0  ;;  %v1928_v11 = vpop.permute.xlu1 %1927 }
 0xabc   : > { %v1992_v13 = vadd.f32 %v1991_v10, %v1928_v11 }
 0xabe   : > { %v2222_v52 = vpop.permute.xlu0 %2221 }
 0xac3   : > { %v1993_v0 = vpop.f32.mrf.mxu0  ;;  %v2217_v47 = vpop.permute.xlu1 %2216 }
 0xac4   : > { %v1994_v16 = vadd.f32 %v1993_v0, %v1933_v12 }
 0xac6   : > { %v2144_v18 = vpack.c.bf16 %v1994_v16, %v1992_v13 }
 0xac9   : > { %2663 = vmatmul.msk.bf16.gmra.mxu2 %vm674_vm14, %v2142_v1 }
 0xacb   : > { %v2227_v30 = vpop.permute.xlu1 %2226 }
 0xad9   : > { %2664 = vmatmul.msk.bf16.gmra.mxu2 %vm674_vm14, %v2143_v9 }
 0xae9   : > { %2665 = vmatmul.msk.bf16.gmra.mxu2 %vm674_vm14, %v2144_v18 }
 0xb3c   : > { %v2174_v19 = vpop.f32.mrf.mxu2 }
 0xb44   : > { %v2176_v51 = vpop.f32.mrf.mxu2 }
 0xb45   : > { %v2194_v40 = vpack.c.bf16 %v2176_v51, %v2174_v19 }
 0xb4c   : > { %v2179_v21 = vpop.f32.mrf.mxu2 }
 0xb54   : > { %v2181_v23 = vpop.f32.mrf.mxu2 }
 0xb55   : > { %v2195_v39 = vpack.c.bf16 %v2181_v23, %v2179_v21 }
 0xb5c   : > { %v2184_v24 = vpop.f32.mrf.mxu2 }
 0xb64   : > { %v2186_v25 = vpop.f32.mrf.mxu2 }
 0xb65   : > { %v2196_v37 = vpack.c.bf16 %v2186_v25, %v2184_v24 }
 0xb6c   : > { %v2189_v26 = vpop.f32.mrf.mxu2 }
 0xb74   : > { %v2191_v28 = vpop.f32.mrf.mxu2 }
 0xb75   : > { %v2197_v53 = vpack.c.bf16 %v2191_v28, %v2189_v26 }
 0xb77   : > { %2290 = vmatpush.bf16.msra.mxu3 %v2197_v53 }
 0xb7b   : > { %2291 = vmatpush.bf16.msra.mxu3 %v2196_v37 }
 0xb7f   : > { %2292 = vmatpush.bf16.msra.mxu3 %v2195_v39 }
 0xb83   : > { %2293 = vmatpush.bf16.msra.mxu3 %v2194_v40 }
 0xb86   : > { %2682 = vmatmul.msk.bf16.vlgmr.msra.gmra.mxu3 %vm1309_vm11, %v2743_v42 }
 0xb96   : > { %2683 = vmatmul.msk.bf16.gmra.mxu3 %vm1309_vm11, %v2744_v44 }
 0xba6   : > { %2684 = vmatmul.msk.bf16.gmra.mxu3 %vm1309_vm11, %v2745_v46 }
 0xbb6   : > { %2685 = vmatmul.msk.bf16.gmra.mxu3 %vm1309_vm11, %v2746_v31 }
 0xc09   : > { %v2295_v48 = vpop.f32.mrf.mxu3 }
 0xc0a   : > { %v2296_v20 = vadd.f32 %v2295_v48, %v2217_v47 }
 0xc0c   : > { %v2315_v50 = vadd.f32 %v2296_v20, %v3362_v27  ;;  %v2232_v27 = vpop.permute.xlu0 %2231 }
 0xc0e   : > { %2323 = vst.msk [vmem:[%s3545_s18] sm:$0xff] %vm674_vm14, %v2315_v50 }
 0xc11   : > { %v2297_v22 = vpop.f32.mrf.mxu3 }
 0xc12   : > { %v2298_v55 = vadd.f32 %v2297_v22, %v2222_v52 }
 0xc14   : > { %v2316_v17 = vadd.f32 %v2298_v55, %v3359_v56  ;;  %v2237_v56 = vpop.permute.xlu1 %2236 }
 0xc16   : > { %2324 = vst.msk [vmem:[%s3545_s18 + $0x8] sm:$0xff] %vm674_vm14, %v2316_v17 }
 0xc19   : > { %v2300_v58 = vpop.f32.mrf.mxu3 }
 0xc1a   : > { %v2301_v34 = vadd.f32 %v2300_v58, %v2227_v30 }
 0xc1c   : > { %v2317_v43 = vadd.f32 %v2301_v34, %v3354_v54  ;;  %v2242_v54 = vpop.permute.xlu0 %2241  ;;  %v2247_v3 = vpop.permute.xlu1 %2246 }
 0xc1e   : > { %2325 = vst.msk [vmem:[%s3545_s18 + $0x10] sm:$0xff] %vm674_vm14, %v2317_v43 }
 0xc21   : > { %v2302_v59 = vpop.f32.mrf.mxu3 }
 0xc22   : > { %v2303_v29 = vadd.f32 %v2302_v59, %v2232_v27 }
 0xc24   : > { %v2318_v38 = vadd.f32 %v2303_v29, %v3351_v49  ;;  %v2252_v32 = vpop.permute.xlu0 %2251 }
 0xc26   : > { %2326 = vst.msk [vmem:[%s3545_s18 + $0x18] sm:$0xff] %vm674_vm14, %v2318_v38 }
 0xc29   : > { %v2305_v14 = vpop.f32.mrf.mxu3 }
 0xc2a   : > { %v2306_v45 = vadd.f32 %v2305_v14, %v2237_v56 }
 0xc2c   : > { %v2319_v60 = vadd.f32 %v2306_v45, %v3345_v33 }
 0xc2e   : > { %2327 = vst.msk [vmem:[%s3545_s18 + $0x20] sm:$0xff] %vm674_vm14, %v2319_v60 }
 0xc31   : > { %v2307_v61 = vpop.f32.mrf.mxu3 }
 0xc32   : > { %v2308_v62 = vadd.f32 %v2307_v61, %v2242_v54 }
 0xc34   : > { %v2320_v63 = vadd.f32 %v2308_v62, %v3341_v41 }
 0xc36   : > { %2328 = vst.msk [vmem:[%s3545_s18 + $0x28] sm:$0xff] %vm674_vm14, %v2320_v63 }
 0xc39   : > { %v2310_v49 = vpop.f32.mrf.mxu3 }
 0xc3a   : > { %v2311_v5 = vadd.f32 %v2310_v49, %v2247_v3 }
 0xc3c   : > { %v2321_v6 = vadd.f32 %v2311_v5, %v3333_v35 }
 0xc3e   : > { %2329 = vst.msk [vmem:[%s3545_s18 + $0x30] sm:$0xff] %vm674_vm14, %v2321_v6 }
 0xc41   : > { %v2312_v4 = vpop.f32.mrf.mxu3 }
 0xc42   : > { %v2313_v33 = vadd.f32 %v2312_v4, %v2252_v32 }
 0xc44   : > { %v2322_v1 = vadd.f32 %v2313_v33, %v3335_v36 }
 0xc46   : > { %2330 = vst.msk [vmem:[%s3545_s18 + $0x38] sm:$0xff] %vm674_vm14, %v2322_v1 }
 0xc47 PF: > { %s13_s12 = sadd.s32 1, %s2899_s12  }
 0xc48   : > { %p10_p4 = scmp.ge.s32.totalorder %s13_s12, 4  }
 0xc4a   :  { %12 = sbr.rel (!%p10_p4) target bundleno = 1 (0x1), region = 62 }

</bundles_post_ra>
